<compile_context>
chip_gen: v6e
topology: v6e:2x2x1
jax: 0.10.0
libtpu: 0.0.40
codegen_flags: <defaults>
</compile_context>

<pallas_src>
import functools

import numpy as np
import jax
import jax.numpy as jnp
from jax.experimental import pallas as pl
from jax.experimental.pallas import tpu as pltpu


# ------------------------------ fused kernel ------------------------------

def _lenet_fused_kernel(x_ref, w1_ref, b1_ref, sr1_ref, sc1_ref,
                        w2_ref, b2_ref, sr2_ref, sc2_ref,
                        fw1_ref, fb1_ref, fw2_ref, fb2_ref, fw3_ref, fb3_ref,
                        o_ref, p1_scr, p2_scr):
    """One image per grid step.  x_ref: (32, 96) with columns = w*3 + c."""
    dot = functools.partial(jnp.dot, preferred_element_type=jnp.float32)

    # ---- conv1 + bias + relu: (32, 32*3) -> (28, 28*6) -------------------
    # Banded matmul accumulation over the 5 kernel rows (im2col stays in VMEM).
    y1 = dot(x_ref[0:28, :], w1_ref[0])
    for i in range(1, 5):
        y1 = y1 + dot(x_ref[i:i + 28, :], w1_ref[i])
    y1 = jnp.maximum(y1 + b1_ref[...], 0.0)                        # (28, 168)

    # ---- maxpool 2x2 (fused): row-pair then col-pair selection matmuls ---
    r1 = jnp.maximum(dot(sr1_ref[0], y1), dot(sr1_ref[1], y1))     # (14, 168)
    p1_scr[...] = jnp.maximum(dot(r1, sc1_ref[0]), dot(r1, sc1_ref[1]))  # (14, 84)

    # ---- conv2 + bias + relu: (14, 14*6) -> (10, 10*16) ------------------
    y2 = dot(p1_scr[0:10, :], w2_ref[0])
    for i in range(1, 5):
        y2 = y2 + dot(p1_scr[i:i + 10, :], w2_ref[i])
    y2 = jnp.maximum(y2 + b2_ref[...], 0.0)                        # (10, 160)

    # ---- maxpool 2x2 (fused) ---------------------------------------------
    r2 = jnp.maximum(dot(sr2_ref[0], y2), dot(sr2_ref[1], y2))     # (5, 160)
    p2_scr[...] = jnp.maximum(dot(r2, sc2_ref[0]), dot(r2, sc2_ref[1]))  # (5, 80)

    # ---- fc1 + relu: contract over the 5 pooled rows (no in-kernel flatten)
    h1 = fb1_ref[...]                                              # (1, 120)
    for h in range(5):
        h1 = h1 + dot(p2_scr[h:h + 1, :], fw1_ref[h])
    h1 = jnp.maximum(h1, 0.0)

    # ---- fc2 + relu, fc3 ---------------------------------------------------
    h2 = jnp.maximum(dot(h1, fw2_ref[...]) + fb2_ref[...], 0.0)    # (1, 84)
    out = dot(h2, fw3_ref[...]) + fb3_ref[...]                     # (1, 10)
    o_ref[...] = out.astype(o_ref.dtype)


# --------------------- one-time host-side weight re-layout -----------------

def _banded_conv(w, in_w):
    """torch (Cout, Cin, k, k) -> (k, in_w*Cin, Wo*Cout) banded matrices so that
    conv == sum_i  X[i:i+Wo_rows, :] @ W[i]  with columns packed as w*C + c."""
    w = np.asarray(w, np.float32)
    cout, cin, k, _ = w.shape
    wo = in_w - k + 1
    bw = np.zeros((k, in_w * cin, wo * cout), np.float32)
    for i in range(k):
        for j in range(k):
            blk = w[:, :, i, j].T                     # (cin, cout)
            for o in range(wo):
                bw[i, (o + j) * cin:(o + j + 1) * cin,
                   o * cout:(o + 1) * cout] = blk
    return bw


def _pool_row_select(h_out):
    s = np.zeros((2, h_out, 2 * h_out), np.float32)
    r = np.arange(h_out)
    s[0, r, 2 * r] = 1.0
    s[1, r, 2 * r + 1] = 1.0
    return s


def _pool_col_select(w_out, c):
    s = np.zeros((2, 2 * w_out * c, w_out * c), np.float32)
    ch = np.arange(c)
    for o in range(w_out):
        s[0, (2 * o) * c + ch, o * c + ch] = 1.0
        s[1, (2 * o + 1) * c + ch, o * c + ch] = 1.0
    return s


def prepare_params(params):
    """Re-layout torch-style parameters into kernel-friendly constants (host, once)."""
    # fc1 weight permuted from torch.flatten order (c*25 + h*5 + w) to the
    # kernel's pooled layout p2[h, w*16 + c].
    fc1_w = np.asarray(params["fc1_w"], np.float32)               # (120, 400)
    fw1 = np.zeros((5, 5 * 16, 120), np.float32)
    for h in range(5):
        for w in range(5):
            for c in range(16):
                fw1[h, w * 16 + c, :] = fc1_w[:, c * 25 + h * 5 + w]

    c1b = np.asarray(params["conv1_b"], np.float32)
    c2b = np.asarray(params["conv2_b"], np.float32)
    return dict(
        w1b=jnp.asarray(_banded_conv(params["conv1_w"], 32)),      # (5, 96, 168)
        b1t=jnp.asarray(np.tile(c1b, 28)[None, :]),                # (1, 168)
        sr1=jnp.asarray(_pool_row_select(14)),                     # (2, 14, 28)
        sc1=jnp.asarray(_pool_col_select(14, 6)),                  # (2, 168, 84)
        w2b=jnp.asarray(_banded_conv(params["conv2_w"], 14)),      # (5, 84, 160)
        b2t=jnp.asarray(np.tile(c2b, 10)[None, :]),                # (1, 160)
        sr2=jnp.asarray(_pool_row_select(5)),                      # (2, 5, 10)
        sc2=jnp.asarray(_pool_col_select(5, 16)),                  # (2, 160, 80)
        fw1=jnp.asarray(fw1),                                      # (5, 80, 120)
        fb1=jnp.asarray(np.asarray(params["fc1_b"], np.float32)[None, :]),
        fw2=jnp.asarray(np.asarray(params["fc2_w"], np.float32).T),  # (120, 84)
        fb2=jnp.asarray(np.asarray(params["fc2_b"], np.float32)[None, :]),
        fw3=jnp.asarray(np.asarray(params["fc3_w"], np.float32).T),  # (84, 10)
        fb3=jnp.asarray(np.asarray(params["fc3_b"], np.float32)[None, :]),
    )


# ------------------------------- forward pass ------------------------------

_CONST_ORDER = ("w1b", "b1t", "sr1", "sc1", "w2b", "b2t", "sr2", "sc2",
                "fw1", "fb1", "fw2", "fb2", "fw3", "fb3")


def _const_spec(arr):
    zeros = (0,) * arr.ndim
    return pl.BlockSpec(arr.shape, lambda b, z=zeros: z)   # grid-invariant, VMEM-resident


@jax.jit
def net_forward(prepared, x_nchw):
    """x_nchw: (N, 3, 32, 32) float32 -> (N, 10) float32."""
    n = x_nchw.shape[0]
    # Single host-of-kernel re-layout: NCHW -> (N, H, W*C) rows=H, lanes=w*3+c.
    x2d = jnp.transpose(x_nchw, (0, 2, 3, 1)).reshape(n, 32, 32 * 3)

    consts = [prepared[k] for k in _CONST_ORDER]
    out = pl.pallas_call(
        _lenet_fused_kernel,
        out_shape=jax.ShapeDtypeStruct((n, 1, 10), jnp.float32),
        grid=(n,),
        in_specs=[pl.BlockSpec((None, 32, 96), lambda b: (b, 0, 0))]
                 + [_const_spec(a) for a in consts],
        out_specs=pl.BlockSpec((None, 1, 10), lambda b: (b, 0, 0)),
        scratch_shapes=[pltpu.VMEM((14, 84), jnp.float32),   # pooled conv1
                        pltpu.VMEM((5, 80), jnp.float32)],   # pooled conv2
        compiler_params=pltpu.CompilerParams(
            dimension_semantics=("parallel",)),
    )(x2d, *consts)
    return out.reshape(n, 10)


# ------------------------------ param init ---------------------------------

def init_params(key):
    def uniform(key, shape, fan_in):
        bound = 1.0 / jnp.sqrt(jnp.float32(fan_in))
        return jax.random.uniform(key, shape, jnp.float32, -bound, bound)

    ks = jax.random.split(key, 10)
    p = {}
    p["conv1_w"] = uniform(ks[0], (6, 3, 5, 5), 3 * 5 * 5)
    p["conv1_b"] = uniform(ks[1], (6,), 3 * 5 * 5)
    p["conv2_w"] = uniform(ks[2], (16, 6, 5, 5), 6 * 5 * 5)
    p["conv2_b"] = uniform(ks[3], (16,), 6 * 5 * 5)
    p["fc1_w"] = uniform(ks[4], (120, 16 * 5 * 5), 16 * 5 * 5)
    p["fc1_b"] = uniform(ks[5], (120,), 16 * 5 * 5)
    p["fc2_w"] = uniform(ks[6], (84, 120), 120)
    p["fc2_b"] = uniform(ks[7], (84,), 120)
    p["fc3_w"] = uniform(ks[8], (10, 84), 84)
    p["fc3_b"] = uniform(ks[9], (10,), 84)
    return p


if __name__ == "__main__":
    key = jax.random.PRNGKey(0)
    pkey, xkey = jax.random.split(key)
    params = init_params(pkey)
    prepared = prepare_params(params)

    # CIFAR-10 shaped input (32x32 is required by the 16*5*5 flatten), batch=2.
    x = jax.random.normal(xkey, (2, 3, 32, 32), jnp.float32)
    out = net_forward(prepared, x)
    out = jax.block_until_ready(out)

    assert out.shape == (2, 10) and out.dtype == jnp.float32
    assert bool(jnp.all(jnp.isfinite(out)))
    print("KERNEL_OK")
</pallas_src>

<mosaic_0001>
module attributes {stable_mosaic.version = 11 : i64} {
  func.func @_lenet_fused_kernel(%arg0: i32, %arg1: memref<1x32x96xf32, #tpu.memory_space<vmem>>, %arg2: memref<5x96x168xf32, #tpu.memory_space<vmem>>, %arg3: memref<1x168xf32, #tpu.memory_space<vmem>>, %arg4: memref<2x14x28xf32, #tpu.memory_space<vmem>>, %arg5: memref<2x168x84xf32, #tpu.memory_space<vmem>>, %arg6: memref<5x84x160xf32, #tpu.memory_space<vmem>>, %arg7: memref<1x160xf32, #tpu.memory_space<vmem>>, %arg8: memref<2x5x10xf32, #tpu.memory_space<vmem>>, %arg9: memref<2x160x80xf32, #tpu.memory_space<vmem>>, %arg10: memref<5x80x120xf32, #tpu.memory_space<vmem>>, %arg11: memref<1x120xf32, #tpu.memory_space<vmem>>, %arg12: memref<120x84xf32, #tpu.memory_space<vmem>>, %arg13: memref<1x84xf32, #tpu.memory_space<vmem>>, %arg14: memref<84x10xf32, #tpu.memory_space<vmem>>, %arg15: memref<1x10xf32, #tpu.memory_space<vmem>>, %arg16: memref<1x1x10xf32, #tpu.memory_space<vmem>>, %arg17: memref<14x84xf32, #tpu.memory_space<vmem>>, %arg18: memref<5x80xf32, #tpu.memory_space<vmem>>) attributes {dimension_semantics = [#tpu.dimension_semantics<parallel>], iteration_bounds = array<i64: 2>, scalar_prefetch = 0 : i64, scratch_operands = 2 : i64, tpu.core_type = #tpu.core_type<tc>, window_params = [{transform_indices = @transform_0, window_bounds = array<i64: 1, 32, 96>}, {pipeline_mode = #tpu.pipeline_mode<synchronous>, transform_indices = @transform_1, window_bounds = array<i64: 5, 96, 168>}, {pipeline_mode = #tpu.pipeline_mode<synchronous>, transform_indices = @transform_2, window_bounds = array<i64: 1, 168>}, {pipeline_mode = #tpu.pipeline_mode<synchronous>, transform_indices = @transform_3, window_bounds = array<i64: 2, 14, 28>}, {pipeline_mode = #tpu.pipeline_mode<synchronous>, transform_indices = @transform_4, window_bounds = array<i64: 2, 168, 84>}, {pipeline_mode = #tpu.pipeline_mode<synchronous>, transform_indices = @transform_5, window_bounds = array<i64: 5, 84, 160>}, {pipeline_mode = #tpu.pipeline_mode<synchronous>, transform_indices = @transform_6, window_bounds = array<i64: 1, 160>}, {pipeline_mode = #tpu.pipeline_mode<synchronous>, transform_indices = @transform_7, window_bounds = array<i64: 2, 5, 10>}, {pipeline_mode = #tpu.pipeline_mode<synchronous>, transform_indices = @transform_8, window_bounds = array<i64: 2, 160, 80>}, {pipeline_mode = #tpu.pipeline_mode<synchronous>, transform_indices = @transform_9, window_bounds = array<i64: 5, 80, 120>}, {pipeline_mode = #tpu.pipeline_mode<synchronous>, transform_indices = @transform_10, window_bounds = array<i64: 1, 120>}, {pipeline_mode = #tpu.pipeline_mode<synchronous>, transform_indices = @transform_11, window_bounds = array<i64: 120, 84>}, {pipeline_mode = #tpu.pipeline_mode<synchronous>, transform_indices = @transform_12, window_bounds = array<i64: 1, 84>}, {pipeline_mode = #tpu.pipeline_mode<synchronous>, transform_indices = @transform_13, window_bounds = array<i64: 84, 10>}, {pipeline_mode = #tpu.pipeline_mode<synchronous>, transform_indices = @transform_14, window_bounds = array<i64: 1, 10>}, {transform_indices = @transform_15, window_bounds = array<i64: 1, 1, 10>}]} {
    %c0 = arith.constant 0 : index
    %c0_0 = arith.constant 0 : index
    %c0_1 = arith.constant 0 : index
    %0 = vector.load %arg1[%c0, %c0_0, %c0_1] : memref<1x32x96xf32, #tpu.memory_space<vmem>>, vector<1x28x96xf32>
    %1 = vector.shape_cast %0 : vector<1x28x96xf32> to vector<28x96xf32>
    %c0_2 = arith.constant 0 : index
    %c0_3 = arith.constant 0 : index
    %c0_4 = arith.constant 0 : index
    %2 = vector.load %arg2[%c0_2, %c0_3, %c0_4] : memref<5x96x168xf32, #tpu.memory_space<vmem>>, vector<1x96x168xf32>
    %3 = vector.shape_cast %2 : vector<1x96x168xf32> to vector<96x168xf32>
    %cst = arith.constant dense<0.000000e+00> : vector<28x168xf32>
    %4 = tpu.matmul %1, %3, %cst {dimension_numbers = #tpu.dot_dimension_numbers<[1], [0], [0], [1], [0, 0, 1, 1], [], []>} : vector<28x96xf32>, vector<96x168xf32>, vector<28x168xf32> -> vector<28x168xf32>
    %c0_5 = arith.constant 0 : index
    %c1 = arith.constant 1 : index
    %c0_6 = arith.constant 0 : index
    %5 = vector.load %arg1[%c0_5, %c1, %c0_6] : memref<1x32x96xf32, #tpu.memory_space<vmem>>, vector<1x28x96xf32>
    %6 = vector.shape_cast %5 : vector<1x28x96xf32> to vector<28x96xf32>
    %c1_7 = arith.constant 1 : index
    %c0_8 = arith.constant 0 : index
    %c0_9 = arith.constant 0 : index
    %7 = vector.load %arg2[%c1_7, %c0_8, %c0_9] : memref<5x96x168xf32, #tpu.memory_space<vmem>>, vector<1x96x168xf32>
    %8 = vector.shape_cast %7 : vector<1x96x168xf32> to vector<96x168xf32>
    %cst_10 = arith.constant dense<0.000000e+00> : vector<28x168xf32>
    %9 = tpu.matmul %6, %8, %cst_10 {dimension_numbers = #tpu.dot_dimension_numbers<[1], [0], [0], [1], [0, 0, 1, 1], [], []>} : vector<28x96xf32>, vector<96x168xf32>, vector<28x168xf32> -> vector<28x168xf32>
    %10 = arith.addf %4, %9 : vector<28x168xf32>
    %c0_11 = arith.constant 0 : index
    %c2 = arith.constant 2 : index
    %c0_12 = arith.constant 0 : index
    %11 = vector.load %arg1[%c0_11, %c2, %c0_12] : memref<1x32x96xf32, #tpu.memory_space<vmem>>, vector<1x28x96xf32>
    %12 = vector.shape_cast %11 : vector<1x28x96xf32> to vector<28x96xf32>
    %c2_13 = arith.constant 2 : index
    %c0_14 = arith.constant 0 : index
    %c0_15 = arith.constant 0 : index
    %13 = vector.load %arg2[%c2_13, %c0_14, %c0_15] : memref<5x96x168xf32, #tpu.memory_space<vmem>>, vector<1x96x168xf32>
    %14 = vector.shape_cast %13 : vector<1x96x168xf32> to vector<96x168xf32>
    %cst_16 = arith.constant dense<0.000000e+00> : vector<28x168xf32>
    %15 = tpu.matmul %12, %14, %cst_16 {dimension_numbers = #tpu.dot_dimension_numbers<[1], [0], [0], [1], [0, 0, 1, 1], [], []>} : vector<28x96xf32>, vector<96x168xf32>, vector<28x168xf32> -> vector<28x168xf32>
    %16 = arith.addf %10, %15 : vector<28x168xf32>
    %c0_17 = arith.constant 0 : index
    %c3 = arith.constant 3 : index
    %c0_18 = arith.constant 0 : index
    %17 = vector.load %arg1[%c0_17, %c3, %c0_18] : memref<1x32x96xf32, #tpu.memory_space<vmem>>, vector<1x28x96xf32>
    %18 = vector.shape_cast %17 : vector<1x28x96xf32> to vector<28x96xf32>
    %c3_19 = arith.constant 3 : index
    %c0_20 = arith.constant 0 : index
    %c0_21 = arith.constant 0 : index
    %19 = vector.load %arg2[%c3_19, %c0_20, %c0_21] : memref<5x96x168xf32, #tpu.memory_space<vmem>>, vector<1x96x168xf32>
    %20 = vector.shape_cast %19 : vector<1x96x168xf32> to vector<96x168xf32>
    %cst_22 = arith.constant dense<0.000000e+00> : vector<28x168xf32>
    %21 = tpu.matmul %18, %20, %cst_22 {dimension_numbers = #tpu.dot_dimension_numbers<[1], [0], [0], [1], [0, 0, 1, 1], [], []>} : vector<28x96xf32>, vector<96x168xf32>, vector<28x168xf32> -> vector<28x168xf32>
    %22 = arith.addf %16, %21 : vector<28x168xf32>
    %c0_23 = arith.constant 0 : index
    %c4 = arith.constant 4 : index
    %c0_24 = arith.constant 0 : index
    %23 = vector.load %arg1[%c0_23, %c4, %c0_24] : memref<1x32x96xf32, #tpu.memory_space<vmem>>, vector<1x28x96xf32>
    %24 = vector.shape_cast %23 : vector<1x28x96xf32> to vector<28x96xf32>
    %c4_25 = arith.constant 4 : index
    %c0_26 = arith.constant 0 : index
    %c0_27 = arith.constant 0 : index
    %25 = vector.load %arg2[%c4_25, %c0_26, %c0_27] : memref<5x96x168xf32, #tpu.memory_space<vmem>>, vector<1x96x168xf32>
    %26 = vector.shape_cast %25 : vector<1x96x168xf32> to vector<96x168xf32>
    %cst_28 = arith.constant dense<0.000000e+00> : vector<28x168xf32>
    %27 = tpu.matmul %24, %26, %cst_28 {dimension_numbers = #tpu.dot_dimension_numbers<[1], [0], [0], [1], [0, 0, 1, 1], [], []>} : vector<28x96xf32>, vector<96x168xf32>, vector<28x168xf32> -> vector<28x168xf32>
    %28 = arith.addf %22, %27 : vector<28x168xf32>
    %c0_29 = arith.constant 0 : index
    %c0_30 = arith.constant 0 : index
    %29 = vector.load %arg3[%c0_29, %c0_30] : memref<1x168xf32, #tpu.memory_space<vmem>>, vector<1x168xf32>
    %30 = vector.broadcast %29 : vector<1x168xf32> to vector<28x168xf32>
    %31 = arith.addf %28, %30 : vector<28x168xf32>
    %cst_31 = arith.constant 0.000000e+00 : f32
    %32 = vector.broadcast %cst_31 : f32 to vector<28x168xf32>
    %33 = arith.maximumf %31, %32 : vector<28x168xf32>
    %c0_32 = arith.constant 0 : index
    %c0_33 = arith.constant 0 : index
    %c0_34 = arith.constant 0 : index
    %34 = vector.load %arg4[%c0_32, %c0_33, %c0_34] : memref<2x14x28xf32, #tpu.memory_space<vmem>>, vector<1x14x28xf32>
    %35 = vector.shape_cast %34 : vector<1x14x28xf32> to vector<14x28xf32>
    %cst_35 = arith.constant dense<0.000000e+00> : vector<14x168xf32>
    %36 = tpu.matmul %35, %33, %cst_35 {dimension_numbers = #tpu.dot_dimension_numbers<[1], [0], [0], [1], [0, 0, 1, 1], [], []>} : vector<14x28xf32>, vector<28x168xf32>, vector<14x168xf32> -> vector<14x168xf32>
    %c1_36 = arith.constant 1 : index
    %c0_37 = arith.constant 0 : index
    %c0_38 = arith.constant 0 : index
    %37 = vector.load %arg4[%c1_36, %c0_37, %c0_38] : memref<2x14x28xf32, #tpu.memory_space<vmem>>, vector<1x14x28xf32>
    %38 = vector.shape_cast %37 : vector<1x14x28xf32> to vector<14x28xf32>
    %cst_39 = arith.constant dense<0.000000e+00> : vector<14x168xf32>
    %39 = tpu.matmul %38, %33, %cst_39 {dimension_numbers = #tpu.dot_dimension_numbers<[1], [0], [0], [1], [0, 0, 1, 1], [], []>} : vector<14x28xf32>, vector<28x168xf32>, vector<14x168xf32> -> vector<14x168xf32>
    %40 = arith.maximumf %36, %39 : vector<14x168xf32>
    %c0_40 = arith.constant 0 : index
    %c0_41 = arith.constant 0 : index
    %c0_42 = arith.constant 0 : index
    %41 = vector.load %arg5[%c0_40, %c0_41, %c0_42] : memref<2x168x84xf32, #tpu.memory_space<vmem>>, vector<1x168x84xf32>
    %42 = vector.shape_cast %41 : vector<1x168x84xf32> to vector<168x84xf32>
    %cst_43 = arith.constant dense<0.000000e+00> : vector<14x84xf32>
    %43 = tpu.matmul %40, %42, %cst_43 {dimension_numbers = #tpu.dot_dimension_numbers<[1], [0], [0], [1], [0, 0, 1, 1], [], []>} : vector<14x168xf32>, vector<168x84xf32>, vector<14x84xf32> -> vector<14x84xf32>
    %c1_44 = arith.constant 1 : index
    %c0_45 = arith.constant 0 : index
    %c0_46 = arith.constant 0 : index
    %44 = vector.load %arg5[%c1_44, %c0_45, %c0_46] : memref<2x168x84xf32, #tpu.memory_space<vmem>>, vector<1x168x84xf32>
    %45 = vector.shape_cast %44 : vector<1x168x84xf32> to vector<168x84xf32>
    %cst_47 = arith.constant dense<0.000000e+00> : vector<14x84xf32>
    %46 = tpu.matmul %40, %45, %cst_47 {dimension_numbers = #tpu.dot_dimension_numbers<[1], [0], [0], [1], [0, 0, 1, 1], [], []>} : vector<14x168xf32>, vector<168x84xf32>, vector<14x84xf32> -> vector<14x84xf32>
    %47 = arith.maximumf %43, %46 : vector<14x84xf32>
    %c0_48 = arith.constant 0 : index
    %c0_49 = arith.constant 0 : index
    %48 = vector.load %arg17[%c0_48, %c0_49] : memref<14x84xf32, #tpu.memory_space<vmem>>, vector<14x84xf32>
    tpu.vector_store %arg17[%c0_48, %c0_49], %47 {strides = array<i32>} : memref<14x84xf32, #tpu.memory_space<vmem>>, vector<14x84xf32>,
    %c0_50 = arith.constant 0 : index
    %c0_51 = arith.constant 0 : index
    %49 = vector.load %arg17[%c0_50, %c0_51] : memref<14x84xf32, #tpu.memory_space<vmem>>, vector<10x84xf32>
    %c0_52 = arith.constant 0 : index
    %c0_53 = arith.constant 0 : index
    %c0_54 = arith.constant 0 : index
    %50 = vector.load %arg6[%c0_52, %c0_53, %c0_54] : memref<5x84x160xf32, #tpu.memory_space<vmem>>, vector<1x84x160xf32>
    %51 = vector.shape_cast %50 : vector<1x84x160xf32> to vector<84x160xf32>
    %cst_55 = arith.constant dense<0.000000e+00> : vector<10x160xf32>
    %52 = tpu.matmul %49, %51, %cst_55 {dimension_numbers = #tpu.dot_dimension_numbers<[1], [0], [0], [1], [0, 0, 1, 1], [], []>} : vector<10x84xf32>, vector<84x160xf32>, vector<10x160xf32> -> vector<10x160xf32>
    %c1_56 = arith.constant 1 : index
    %c0_57 = arith.constant 0 : index
    %53 = vector.load %arg17[%c1_56, %c0_57] : memref<14x84xf32, #tpu.memory_space<vmem>>, vector<10x84xf32>
    %c1_58 = arith.constant 1 : index
    %c0_59 = arith.constant 0 : index
    %c0_60 = arith.constant 0 : index
    %54 = vector.load %arg6[%c1_58, %c0_59, %c0_60] : memref<5x84x160xf32, #tpu.memory_space<vmem>>, vector<1x84x160xf32>
    %55 = vector.shape_cast %54 : vector<1x84x160xf32> to vector<84x160xf32>
    %cst_61 = arith.constant dense<0.000000e+00> : vector<10x160xf32>
    %56 = tpu.matmul %53, %55, %cst_61 {dimension_numbers = #tpu.dot_dimension_numbers<[1], [0], [0], [1], [0, 0, 1, 1], [], []>} : vector<10x84xf32>, vector<84x160xf32>, vector<10x160xf32> -> vector<10x160xf32>
    %57 = arith.addf %52, %56 : vector<10x160xf32>
    %c2_62 = arith.constant 2 : index
    %c0_63 = arith.constant 0 : index
    %58 = vector.load %arg17[%c2_62, %c0_63] : memref<14x84xf32, #tpu.memory_space<vmem>>, vector<10x84xf32>
    %c2_64 = arith.constant 2 : index
    %c0_65 = arith.constant 0 : index
    %c0_66 = arith.constant 0 : index
    %59 = vector.load %arg6[%c2_64, %c0_65, %c0_66] : memref<5x84x160xf32, #tpu.memory_space<vmem>>, vector<1x84x160xf32>
    %60 = vector.shape_cast %59 : vector<1x84x160xf32> to vector<84x160xf32>
    %cst_67 = arith.constant dense<0.000000e+00> : vector<10x160xf32>
    %61 = tpu.matmul %58, %60, %cst_67 {dimension_numbers = #tpu.dot_dimension_numbers<[1], [0], [0], [1], [0, 0, 1, 1], [], []>} : vector<10x84xf32>, vector<84x160xf32>, vector<10x160xf32> -> vector<10x160xf32>
    %62 = arith.addf %57, %61 : vector<10x160xf32>
    %c3_68 = arith.constant 3 : index
    %c0_69 = arith.constant 0 : index
    %63 = vector.load %arg17[%c3_68, %c0_69] : memref<14x84xf32, #tpu.memory_space<vmem>>, vector<10x84xf32>
    %c3_70 = arith.constant 3 : index
    %c0_71 = arith.constant 0 : index
    %c0_72 = arith.constant 0 : index
    %64 = vector.load %arg6[%c3_70, %c0_71, %c0_72] : memref<5x84x160xf32, #tpu.memory_space<vmem>>, vector<1x84x160xf32>
    %65 = vector.shape_cast %64 : vector<1x84x160xf32> to vector<84x160xf32>
    %cst_73 = arith.constant dense<0.000000e+00> : vector<10x160xf32>
    %66 = tpu.matmul %63, %65, %cst_73 {dimension_numbers = #tpu.dot_dimension_numbers<[1], [0], [0], [1], [0, 0, 1, 1], [], []>} : vector<10x84xf32>, vector<84x160xf32>, vector<10x160xf32> -> vector<10x160xf32>
    %67 = arith.addf %62, %66 : vector<10x160xf32>
    %c4_74 = arith.constant 4 : index
    %c0_75 = arith.constant 0 : index
    %68 = vector.load %arg17[%c4_74, %c0_75] : memref<14x84xf32, #tpu.memory_space<vmem>>, vector<10x84xf32>
    %c4_76 = arith.constant 4 : index
    %c0_77 = arith.constant 0 : index
    %c0_78 = arith.constant 0 : index
    %69 = vector.load %arg6[%c4_76, %c0_77, %c0_78] : memref<5x84x160xf32, #tpu.memory_space<vmem>>, vector<1x84x160xf32>
    %70 = vector.shape_cast %69 : vector<1x84x160xf32> to vector<84x160xf32>
    %cst_79 = arith.constant dense<0.000000e+00> : vector<10x160xf32>
    %71 = tpu.matmul %68, %70, %cst_79 {dimension_numbers = #tpu.dot_dimension_numbers<[1], [0], [0], [1], [0, 0, 1, 1], [], []>} : vector<10x84xf32>, vector<84x160xf32>, vector<10x160xf32> -> vector<10x160xf32>
    %72 = arith.addf %67, %71 : vector<10x160xf32>
    %c0_80 = arith.constant 0 : index
    %c0_81 = arith.constant 0 : index
    %73 = vector.load %arg7[%c0_80, %c0_81] : memref<1x160xf32, #tpu.memory_space<vmem>>, vector<1x160xf32>
    %74 = vector.broadcast %73 : vector<1x160xf32> to vector<10x160xf32>
    %75 = arith.addf %72, %74 : vector<10x160xf32>
    %cst_82 = arith.constant 0.000000e+00 : f32
    %76 = vector.broadcast %cst_82 : f32 to vector<10x160xf32>
    %77 = arith.maximumf %75, %76 : vector<10x160xf32>
    %c0_83 = arith.constant 0 : index
    %c0_84 = arith.constant 0 : index
    %c0_85 = arith.constant 0 : index
    %78 = vector.load %arg8[%c0_83, %c0_84, %c0_85] : memref<2x5x10xf32, #tpu.memory_space<vmem>>, vector<1x5x10xf32>
    %79 = vector.shape_cast %78 : vector<1x5x10xf32> to vector<5x10xf32>
    %cst_86 = arith.constant dense<0.000000e+00> : vector<5x160xf32>
    %80 = tpu.matmul %79, %77, %cst_86 {dimension_numbers = #tpu.dot_dimension_numbers<[1], [0], [0], [1], [0, 0, 1, 1], [], []>} : vector<5x10xf32>, vector<10x160xf32>, vector<5x160xf32> -> vector<5x160xf32>
    %c1_87 = arith.constant 1 : index
    %c0_88 = arith.constant 0 : index
    %c0_89 = arith.constant 0 : index
    %81 = vector.load %arg8[%c1_87, %c0_88, %c0_89] : memref<2x5x10xf32, #tpu.memory_space<vmem>>, vector<1x5x10xf32>
    %82 = vector.shape_cast %81 : vector<1x5x10xf32> to vector<5x10xf32>
    %cst_90 = arith.constant dense<0.000000e+00> : vector<5x160xf32>
    %83 = tpu.matmul %82, %77, %cst_90 {dimension_numbers = #tpu.dot_dimension_numbers<[1], [0], [0], [1], [0, 0, 1, 1], [], []>} : vector<5x10xf32>, vector<10x160xf32>, vector<5x160xf32> -> vector<5x160xf32>
    %84 = arith.maximumf %80, %83 : vector<5x160xf32>
    %c0_91 = arith.constant 0 : index
    %c0_92 = arith.constant 0 : index
    %c0_93 = arith.constant 0 : index
    %85 = vector.load %arg9[%c0_91, %c0_92, %c0_93] : memref<2x160x80xf32, #tpu.memory_space<vmem>>, vector<1x160x80xf32>
    %86 = vector.shape_cast %85 : vector<1x160x80xf32> to vector<160x80xf32>
    %cst_94 = arith.constant dense<0.000000e+00> : vector<5x80xf32>
    %87 = tpu.matmul %84, %86, %cst_94 {dimension_numbers = #tpu.dot_dimension_numbers<[1], [0], [0], [1], [0, 0, 1, 1], [], []>} : vector<5x160xf32>, vector<160x80xf32>, vector<5x80xf32> -> vector<5x80xf32>
    %c1_95 = arith.constant 1 : index
    %c0_96 = arith.constant 0 : index
    %c0_97 = arith.constant 0 : index
    %88 = vector.load %arg9[%c1_95, %c0_96, %c0_97] : memref<2x160x80xf32, #tpu.memory_space<vmem>>, vector<1x160x80xf32>
    %89 = vector.shape_cast %88 : vector<1x160x80xf32> to vector<160x80xf32>
    %cst_98 = arith.constant dense<0.000000e+00> : vector<5x80xf32>
    %90 = tpu.matmul %84, %89, %cst_98 {dimension_numbers = #tpu.dot_dimension_numbers<[1], [0], [0], [1], [0, 0, 1, 1], [], []>} : vector<5x160xf32>, vector<160x80xf32>, vector<5x80xf32> -> vector<5x80xf32>
    %91 = arith.maximumf %87, %90 : vector<5x80xf32>
    %c0_99 = arith.constant 0 : index
    %c0_100 = arith.constant 0 : index
    %92 = vector.load %arg18[%c0_99, %c0_100] : memref<5x80xf32, #tpu.memory_space<vmem>>, vector<5x80xf32>
    tpu.vector_store %arg18[%c0_99, %c0_100], %91 {strides = array<i32>} : memref<5x80xf32, #tpu.memory_space<vmem>>, vector<5x80xf32>,
    %c0_101 = arith.constant 0 : index
    %c0_102 = arith.constant 0 : index
    %93 = vector.load %arg11[%c0_101, %c0_102] : memref<1x120xf32, #tpu.memory_space<vmem>>, vector<1x120xf32>
    %c0_103 = arith.constant 0 : index
    %c0_104 = arith.constant 0 : index
    %94 = vector.load %arg18[%c0_103, %c0_104] : memref<5x80xf32, #tpu.memory_space<vmem>>, vector<1x80xf32>
    %c0_105 = arith.constant 0 : index
    %c0_106 = arith.constant 0 : index
    %c0_107 = arith.constant 0 : index
    %95 = vector.load %arg10[%c0_105, %c0_106, %c0_107] : memref<5x80x120xf32, #tpu.memory_space<vmem>>, vector<1x80x120xf32>
    %96 = vector.shape_cast %95 : vector<1x80x120xf32> to vector<80x120xf32>
    %cst_108 = arith.constant dense<0.000000e+00> : vector<1x120xf32>
    %97 = tpu.matmul %94, %96, %cst_108 {dimension_numbers = #tpu.dot_dimension_numbers<[1], [0], [0], [1], [0, 0, 1, 1], [], []>} : vector<1x80xf32>, vector<80x120xf32>, vector<1x120xf32> -> vector<1x120xf32>
    %98 = arith.addf %93, %97 : vector<1x120xf32>
    %c1_109 = arith.constant 1 : index
    %c0_110 = arith.constant 0 : index
    %99 = vector.load %arg18[%c1_109, %c0_110] : memref<5x80xf32, #tpu.memory_space<vmem>>, vector<1x80xf32>
    %c1_111 = arith.constant 1 : index
    %c0_112 = arith.constant 0 : index
    %c0_113 = arith.constant 0 : index
    %100 = vector.load %arg10[%c1_111, %c0_112, %c0_113] : memref<5x80x120xf32, #tpu.memory_space<vmem>>, vector<1x80x120xf32>
    %101 = vector.shape_cast %100 : vector<1x80x120xf32> to vector<80x120xf32>
    %cst_114 = arith.constant dense<0.000000e+00> : vector<1x120xf32>
    %102 = tpu.matmul %99, %101, %cst_114 {dimension_numbers = #tpu.dot_dimension_numbers<[1], [0], [0], [1], [0, 0, 1, 1], [], []>} : vector<1x80xf32>, vector<80x120xf32>, vector<1x120xf32> -> vector<1x120xf32>
    %103 = arith.addf %98, %102 : vector<1x120xf32>
    %c2_115 = arith.constant 2 : index
    %c0_116 = arith.constant 0 : index
    %104 = vector.load %arg18[%c2_115, %c0_116] : memref<5x80xf32, #tpu.memory_space<vmem>>, vector<1x80xf32>
    %c2_117 = arith.constant 2 : index
    %c0_118 = arith.constant 0 : index
    %c0_119 = arith.constant 0 : index
    %105 = vector.load %arg10[%c2_117, %c0_118, %c0_119] : memref<5x80x120xf32, #tpu.memory_space<vmem>>, vector<1x80x120xf32>
    %106 = vector.shape_cast %105 : vector<1x80x120xf32> to vector<80x120xf32>
    %cst_120 = arith.constant dense<0.000000e+00> : vector<1x120xf32>
    %107 = tpu.matmul %104, %106, %cst_120 {dimension_numbers = #tpu.dot_dimension_numbers<[1], [0], [0], [1], [0, 0, 1, 1], [], []>} : vector<1x80xf32>, vector<80x120xf32>, vector<1x120xf32> -> vector<1x120xf32>
    %108 = arith.addf %103, %107 : vector<1x120xf32>
    %c3_121 = arith.constant 3 : index
    %c0_122 = arith.constant 0 : index
    %109 = vector.load %arg18[%c3_121, %c0_122] : memref<5x80xf32, #tpu.memory_space<vmem>>, vector<1x80xf32>
    %c3_123 = arith.constant 3 : index
    %c0_124 = arith.constant 0 : index
    %c0_125 = arith.constant 0 : index
    %110 = vector.load %arg10[%c3_123, %c0_124, %c0_125] : memref<5x80x120xf32, #tpu.memory_space<vmem>>, vector<1x80x120xf32>
    %111 = vector.shape_cast %110 : vector<1x80x120xf32> to vector<80x120xf32>
    %cst_126 = arith.constant dense<0.000000e+00> : vector<1x120xf32>
    %112 = tpu.matmul %109, %111, %cst_126 {dimension_numbers = #tpu.dot_dimension_numbers<[1], [0], [0], [1], [0, 0, 1, 1], [], []>} : vector<1x80xf32>, vector<80x120xf32>, vector<1x120xf32> -> vector<1x120xf32>
    %113 = arith.addf %108, %112 : vector<1x120xf32>
    %c4_127 = arith.constant 4 : index
    %c0_128 = arith.constant 0 : index
    %114 = vector.load %arg18[%c4_127, %c0_128] : memref<5x80xf32, #tpu.memory_space<vmem>>, vector<1x80xf32>
    %c4_129 = arith.constant 4 : index
    %c0_130 = arith.constant 0 : index
    %c0_131 = arith.constant 0 : index
    %115 = vector.load %arg10[%c4_129, %c0_130, %c0_131] : memref<5x80x120xf32, #tpu.memory_space<vmem>>, vector<1x80x120xf32>
    %116 = vector.shape_cast %115 : vector<1x80x120xf32> to vector<80x120xf32>
    %cst_132 = arith.constant dense<0.000000e+00> : vector<1x120xf32>
    %117 = tpu.matmul %114, %116, %cst_132 {dimension_numbers = #tpu.dot_dimension_numbers<[1], [0], [0], [1], [0, 0, 1, 1], [], []>} : vector<1x80xf32>, vector<80x120xf32>, vector<1x120xf32> -> vector<1x120xf32>
    %118 = arith.addf %113, %117 : vector<1x120xf32>
    %cst_133 = arith.constant 0.000000e+00 : f32
    %119 = vector.broadcast %cst_133 : f32 to vector<1x120xf32>
    %120 = arith.maximumf %118, %119 : vector<1x120xf32>
    %c0_134 = arith.constant 0 : index
    %c0_135 = arith.constant 0 : index
    %121 = vector.load %arg12[%c0_134, %c0_135] : memref<120x84xf32, #tpu.memory_space<vmem>>, vector<120x84xf32>
    %cst_136 = arith.constant dense<0.000000e+00> : vector<1x84xf32>
    %122 = tpu.matmul %120, %121, %cst_136 {dimension_numbers = #tpu.dot_dimension_numbers<[1], [0], [0], [1], [0, 0, 1, 1], [], []>} : vector<1x120xf32>, vector<120x84xf32>, vector<1x84xf32> -> vector<1x84xf32>
    %c0_137 = arith.constant 0 : index
    %c0_138 = arith.constant 0 : index
    %123 = vector.load %arg13[%c0_137, %c0_138] : memref<1x84xf32, #tpu.memory_space<vmem>>, vector<1x84xf32>
    %124 = arith.addf %122, %123 : vector<1x84xf32>
    %cst_139 = arith.constant 0.000000e+00 : f32
    %125 = vector.broadcast %cst_139 : f32 to vector<1x84xf32>
    %126 = arith.maximumf %124, %125 : vector<1x84xf32>
    %c0_140 = arith.constant 0 : index
    %c0_141 = arith.constant 0 : index
    %127 = vector.load %arg14[%c0_140, %c0_141] : memref<84x10xf32, #tpu.memory_space<vmem>>, vector<84x10xf32>
    %cst_142 = arith.constant dense<0.000000e+00> : vector<1x10xf32>
    %128 = tpu.matmul %126, %127, %cst_142 {dimension_numbers = #tpu.dot_dimension_numbers<[1], [0], [0], [1], [0, 0, 1, 1], [], []>} : vector<1x84xf32>, vector<84x10xf32>, vector<1x10xf32> -> vector<1x10xf32>
    %c0_143 = arith.constant 0 : index
    %c0_144 = arith.constant 0 : index
    %129 = vector.load %arg15[%c0_143, %c0_144] : memref<1x10xf32, #tpu.memory_space<vmem>>, vector<1x10xf32>
    %130 = arith.addf %128, %129 : vector<1x10xf32>
    %c0_145 = arith.constant 0 : index
    %c0_146 = arith.constant 0 : index
    %c0_147 = arith.constant 0 : index
    %131 = vector.load %arg16[%c0_145, %c0_146, %c0_147] : memref<1x1x10xf32, #tpu.memory_space<vmem>>, vector<1x1x10xf32>
    %132 = vector.shape_cast %131 : vector<1x1x10xf32> to vector<1x10xf32>
    %133 = vector.shape_cast %130 : vector<1x10xf32> to vector<1x1x10xf32>
    tpu.vector_store %arg16[%c0_145, %c0_146, %c0_147], %133 {strides = array<i32>} : memref<1x1x10xf32, #tpu.memory_space<vmem>>, vector<1x1x10xf32>,
    return
  }
  func.func @transform_0(%arg0: i32) -> (i32, i32, i32) {
    %c0_i32 = arith.constant 0 : i32
    %c0_i32_0 = arith.constant 0 : i32
    %c0_i32_1 = arith.constant 0 : i32
    return %arg0, %c0_i32, %c0_i32_0 : i32, i32, i32
  }
  func.func @transform_1(%arg0: i32) -> (i32, i32, i32) {
    %c0_i32 = arith.constant 0 : i32
    %c0_i32_0 = arith.constant 0 : i32
    %c0_i32_1 = arith.constant 0 : i32
    %c0_i32_2 = arith.constant 0 : i32
    return %c0_i32, %c0_i32_0, %c0_i32_1 : i32, i32, i32
  }
  func.func @transform_2(%arg0: i32) -> (i32, i32) {
    %c0_i32 = arith.constant 0 : i32
    %c0_i32_0 = arith.constant 0 : i32
    %c0_i32_1 = arith.constant 0 : i32
    return %c0_i32, %c0_i32_0 : i32, i32
  }
  func.func @transform_3(%arg0: i32) -> (i32, i32, i32) {
    %c0_i32 = arith.constant 0 : i32
    %c0_i32_0 = arith.constant 0 : i32
    %c0_i32_1 = arith.constant 0 : i32
    %c0_i32_2 = arith.constant 0 : i32
    return %c0_i32, %c0_i32_0, %c0_i32_1 : i32, i32, i32
  }
  func.func @transform_4(%arg0: i32) -> (i32, i32, i32) {
    %c0_i32 = arith.constant 0 : i32
    %c0_i32_0 = arith.constant 0 : i32
    %c0_i32_1 = arith.constant 0 : i32
    %c0_i32_2 = arith.constant 0 : i32
    return %c0_i32, %c0_i32_0, %c0_i32_1 : i32, i32, i32
  }
  func.func @transform_5(%arg0: i32) -> (i32, i32, i32) {
    %c0_i32 = arith.constant 0 : i32
    %c0_i32_0 = arith.constant 0 : i32
    %c0_i32_1 = arith.constant 0 : i32
    %c0_i32_2 = arith.constant 0 : i32
    return %c0_i32, %c0_i32_0, %c0_i32_1 : i32, i32, i32
  }
  func.func @transform_6(%arg0: i32) -> (i32, i32) {
    %c0_i32 = arith.constant 0 : i32
    %c0_i32_0 = arith.constant 0 : i32
    %c0_i32_1 = arith.constant 0 : i32
    return %c0_i32, %c0_i32_0 : i32, i32
  }
  func.func @transform_7(%arg0: i32) -> (i32, i32, i32) {
    %c0_i32 = arith.constant 0 : i32
    %c0_i32_0 = arith.constant 0 : i32
    %c0_i32_1 = arith.constant 0 : i32
    %c0_i32_2 = arith.constant 0 : i32
    return %c0_i32, %c0_i32_0, %c0_i32_1 : i32, i32, i32
  }
  func.func @transform_8(%arg0: i32) -> (i32, i32, i32) {
    %c0_i32 = arith.constant 0 : i32
    %c0_i32_0 = arith.constant 0 : i32
    %c0_i32_1 = arith.constant 0 : i32
    %c0_i32_2 = arith.constant 0 : i32
    return %c0_i32, %c0_i32_0, %c0_i32_1 : i32, i32, i32
  }
  func.func @transform_9(%arg0: i32) -> (i32, i32, i32) {
    %c0_i32 = arith.constant 0 : i32
    %c0_i32_0 = arith.constant 0 : i32
    %c0_i32_1 = arith.constant 0 : i32
    %c0_i32_2 = arith.constant 0 : i32
    return %c0_i32, %c0_i32_0, %c0_i32_1 : i32, i32, i32
  }
  func.func @transform_10(%arg0: i32) -> (i32, i32) {
    %c0_i32 = arith.constant 0 : i32
    %c0_i32_0 = arith.constant 0 : i32
    %c0_i32_1 = arith.constant 0 : i32
    return %c0_i32, %c0_i32_0 : i32, i32
  }
  func.func @transform_11(%arg0: i32) -> (i32, i32) {
    %c0_i32 = arith.constant 0 : i32
    %c0_i32_0 = arith.constant 0 : i32
    %c0_i32_1 = arith.constant 0 : i32
    return %c0_i32, %c0_i32_0 : i32, i32
  }
  func.func @transform_12(%arg0: i32) -> (i32, i32) {
    %c0_i32 = arith.constant 0 : i32
    %c0_i32_0 = arith.constant 0 : i32
    %c0_i32_1 = arith.constant 0 : i32
    return %c0_i32, %c0_i32_0 : i32, i32
  }
  func.func @transform_13(%arg0: i32) -> (i32, i32) {
    %c0_i32 = arith.constant 0 : i32
    %c0_i32_0 = arith.constant 0 : i32
    %c0_i32_1 = arith.constant 0 : i32
    return %c0_i32, %c0_i32_0 : i32, i32
  }
  func.func @transform_14(%arg0: i32) -> (i32, i32) {
    %c0_i32 = arith.constant 0 : i32
    %c0_i32_0 = arith.constant 0 : i32
    %c0_i32_1 = arith.constant 0 : i32
    return %c0_i32, %c0_i32_0 : i32, i32
  }
  func.func @transform_15(%arg0: i32) -> (i32, i32, i32) {
    %c0_i32 = arith.constant 0 : i32
    %c0_i32_0 = arith.constant 0 : i32
    %c0_i32_1 = arith.constant 0 : i32
    return %arg0, %c0_i32, %c0_i32_0 : i32, i32, i32
  }
}

</mosaic_0001>

<bundles_post_ra>
// kernel: net_forward.1
= control target key start
LH: loop header
LB: loop body
LE: loop exit
PB: predicated region body
PF: predicated region fallthrough
CT: control target
= control target key end

     0   :  { %20 = vsyncpa [#allocation5], 0  ;;  %s5599_s0 = inlined_call_operand.vmem [shape: f32[2,32,96], index: 0, kind: input, shape index: {}]   ;;  %s5600_s1 = inlined_call_operand.vmem [shape: f32[5,96,168], index: 1, kind: input, shape index: {}]   ;;  %s5601_s2 = inlined_call_operand.vmem [shape: f32[1,168], index: 2, kind: input, shape index: {}]   ;;  %s5602_s3 = inlined_call_operand.vmem [shape: f32[2,14,28], index: 3, kind: input, shape index: {}]   ;;  %s5603_s4 = inlined_call_operand.vmem [shape: f32[2,168,84], index: 4, kind: input, shape index: {}]   ;;  %s5604_s5 = inlined_call_operand.vmem [shape: f32[5,84,160], index: 5, kind: input, shape index: {}]   ;;  %s5605_s6 = inlined_call_operand.vmem [shape: f32[1,160], index: 6, kind: input, shape index: {}]   ;;  %s5606_s7 = inlined_call_operand.vmem [shape: f32[2,5,10], index: 7, kind: input, shape index: {}]   ;;  %s5607_s8 = inlined_call_operand.vmem [shape: f32[2,160,80], index: 8, kind: input, shape index: {}]   ;;  %s5608_s9 = inlined_call_operand.vmem [shape: f32[5,80,120], index: 9, kind: input, shape index: {}]   ;;  %s5609_s10 = inlined_call_operand.vmem [shape: f32[1,120], index: 10, kind: input, shape index: {}]   ;;  %s5610_s11 = inlined_call_operand.vmem [shape: f32[120,84], index: 11, kind: input, shape index: {}]   ;;  %s5611_s12 = inlined_call_operand.vmem [shape: f32[1,84], index: 12, kind: input, shape index: {}]   ;;  %s5612_s13 = inlined_call_operand.vmem [shape: f32[84,10], index: 13, kind: input, shape index: {}]   ;;  %s5613_s14 = inlined_call_operand.vmem [shape: f32[1,10], index: 14, kind: input, shape index: {}]   ;;  %s5614_s15 = inlined_call_operand.hbm [shape: f32[2,1,10], index: 15, kind: output, shape index: {}]  }
   0x1   :  { %22 = vsyncpa [#allocation5 + $0x1], 0  ;;  %s4002_s18 = smov 0   ;;  %s4004_s19 = smov 0  }
   0x2   :  { %s4006_s20 = smov 0   ;;  %s4008_s21 = smov 0  }
   0x3 LB: > { %5621 = sst [smem:[#allocation7_spill]] %s3905_s18  ;;  %s4023_s22 = sadd.s32 4294967295, %s3917_s21   ;;  %s3917_s21 = sphi %s4008_s21, %s5632_s21   ;;  %s3913_s20 = sphi %s4006_s20, %s5637_s20   ;;  %s3909_s19 = sphi %s4004_s19, %s5636_s19   ;;  %s3905_s18 = sphi %s4002_s18, %s5635_s18  }
   0x4   : > { %5622 = sst [smem:[#allocation8_spill]] %s3913_s20  ;;  %s3214_s23 = sadd.s32 4294967294, %s3917_s21  }
   0x5   : > { %5623 = sst [smem:[#allocation9_spill]] %s3917_s21  ;;  %s4027_s24 = sadd.s32 1, %s3917_s21  }
   0x6   : > { %5624 = sst [smem:[#allocation10_spill]] %s4027_s24  ;;  %s355_s25 = sadd.s32 1, %s3913_s20 }
   0x7   : > { %s352_s26 = ssub.s32 %s3917_s21, %s4027_s24  ;;  %p365_p0 = scmp.ne.s32.totalorder %s3913_s20, %s3909_s19 }
   0x8   : > { %p353_p1 = scmp.eq.s32.totalorder %s352_s26, 0  ;;  %p366_p2 = scmp.eq.s32.totalorder %s4023_s22, 1 }
   0x9   : > { %p371_p3 = scmp.ne.s32.totalorder %s3909_s19, %s3905_s18  ;;  %p372_p4 = scmp.eq.s32.totalorder %s3214_s23, 1 }
   0xa   : > { %s4038_s27 = scalar_select %p353_p1, %s3913_s20, %s355_s25  }
   0xb   : > { %p4040_p5 = por %p366_p2, %p365_p0  ;;  %p4044_p6 = por %p372_p4, %p371_p3 }
   0xc   : > { %5625 = sst [smem:[#allocation11_spill]] %s4038_s27  ;;  %p3217_p7 = scmp.ge.s32.totalorder %s3917_s21, 1 }
   0xd   : > { %s5627_s29 = scalar_select %p4044_p6, 1, 0 }
   0xe   : > { %p440_p8 = scmp.lt.s32.totalorder %s3917_s21, 3 }
   0xf   : > { %5628 = sst [smem:[#allocation12_spill]] %s5627_s29 }
  0x10   : > { %p441_p9 = pnand %p3217_p7, %p440_p8 }
  0x11   : > { %p487_p10 = scmp.lt.s32.totalorder (!%p441_p9), %s4023_s22, 1  ;;  %s485_s23 = sand.u32 (!%p441_p9), 1, %s3909_s19  }
  0x12   : > { %444 = sbr.rel (%p441_p9) target bundleno = 2044 (0x7fc), region = 80  ;;  %s3556_s20 = sshll.u32 (!%p441_p9), %s4023_s22, 4 }
  0x13   : > { %s486_s27 = scalar_lea.vmem (!%p441_p9), [#allocation4], %s485_s23  ;;  %s3147_s30 = scalar_lea.sflag (!%p441_p9), [#allocation5], %s485_s23 }
  0x14   : > { %s3159_s24 = sshll.u32 (!%p441_p9), %s486_s27, 4  ;;  %s3160_s24 = int_to_ptr.vmem [resolvable:$true] %s3159_s24 }
  0x15   : > { %s3857_s17 = scalar_lea.vmem (!%p441_p9), %s3160_s24, 16 }
  0x16   : > { %p3858_p11 = scmp.ne.s32.totalorder (!%p441_p9), %s3160_s24, %s3857_s17 }
  0x17   : > { %v3243_v0 = vld [vmem:[%s5600_s1 + $0x178] sm:$0xff]  ;;  %v3242_v2 = vld [vmem:[%s5600_s1 + $0x170] sm:$0xff]  ;;  %v3241_v4 = vld [vmem:[%s5600_s1 + $0x168] sm:$0xff]  ;;  %s4150_s25 = scalar_select %p487_p10, %s4023_s22, 1  ;;  %vm549_vm0 = vcmask 785408   ;;  %v3919_v50 = vmov 0.0  }
  0x18   : > { %v519_v1 = vld [vmem:[%s5600_s1 + $0xb8] sm:$0xff]  ;;  %570 = vmatprep.subr.mxu0 %v3243_v0  ;;  %v518_v3 = vld [vmem:[%s5600_s1 + $0xb0] sm:$0xff]  ;;  %v517_v5 = vld [vmem:[%s5600_s1 + $0xa8] sm:$0xff]  ;;  %626 = vmatprep.mubr.f32.mxu0 %v3919_v50  ;;  %vm1203_vm1 = vcmask 1043456   ;;  %vm1196_vm2 = vcmask 228352   ;;  %vm1398_vm3 = vcmask 326656   ;;  %p3859_p12 = pnand %p3858_p11, %p4040_p5 }
  0x19   : > { %671 = vmatprep.subr.mxu1 %v519_v1  ;;  %571 = vmatpush1.msra.mxu0 %v3242_v2  ;;  %v3240_v6 = vld [vmem:[%s5600_s1 + $0x160] sm:$0xff]  ;;  %v3239_v8 = vld [vmem:[%s5600_s1 + $0x158] sm:$0xff]  ;;  %v3238_v10 = vld [vmem:[%s5600_s1 + $0x150] sm:$0xff]  ;;  %s3559_s16 = sshll.u32 %s4150_s25, 5  ;;  %vm1579_vm4 = vcmask 687104   ;;  %vm1581_vm5 = vcmask 685056   ;;  %s5564_s25 = scalar_lea.hbm %s5614_s15, %s3556_s20 }
  0x1a   : > { %672 = vmatpush1.msra.mxu1 %v518_v3  ;;  %v516_v7 = vld [vmem:[%s5600_s1 + $0xa0] sm:$0xff]  ;;  %572 = vmatprep.subr.mxu0 %v3241_v4  ;;  %v515_v9 = vld [vmem:[%s5600_s1 + $0x98] sm:$0xff]  ;;  %v514_v11 = vld [vmem:[%s5600_s1 + $0x90] sm:$0xff]  ;;  %s4198_s21 = scalar_lea.vmem %s5599_s0, %s3559_s16  ;;  %vm2189_vm6 = vcmask 1041408   ;;  %vm2185_vm7 = vcmask 80896   ;;  %vm2365_vm8 = vcmask 261120   ;;  %p3860_p13 = pneg %p3859_p12 }
  0x1b   : > { %673 = vmatprep.subr.mxu1 %v517_v5  ;;  %573 = vmatpush1.msra.mxu0 %v3240_v6  ;;  %v3237_v12 = vld [vmem:[%s5600_s1 + $0x148] sm:$0xff]  ;;  %v3236_v14 = vld [vmem:[%s5600_s1 + $0x140] sm:$0xff]  ;;  %v3235_v16 = vld [vmem:[%s5600_s1 + $0x138] sm:$0xff]  ;;  %vm3920_vm9 = vmmov 0   ;;  %vm2531_vm10 = vcmask 651264   ;;  %vm2545_vm11 = vcmask 654336  }
  0x1c   : > { %674 = vmatpush1.msra.mxu1 %v516_v7  ;;  %v513_v13 = vld [vmem:[%s5600_s1 + $0x88] sm:$0xff]  ;;  %574 = vmatprep.subr.mxu0 %v3239_v8  ;;  %v512_v15 = vld [vmem:[%s5600_s1 + $0x80] sm:$0xff]  ;;  %v511_v17 = vld [vmem:[%s5600_s1 + $0x78] sm:$0xff]  ;;  %vm2981_vm12 = vcmask 982016   ;;  %vm3144_vm13 = vcmask 73728   ;;  %s3921_s22 = smov [#allocation4]  }
  0x1d   : > { %675 = vmatprep.subr.mxu1 %v515_v9  ;;  %575 = vmatpush1.msra.mxu0 %v3238_v10  ;;  %v3234_v18 = vld [vmem:[%s5600_s1 + $0x130] sm:$0xff]  ;;  %v3233_v20 = vld [vmem:[%s5600_s1 + $0x128] sm:$0xff]  ;;  %v3232_v22 = vld [vmem:[%s5600_s1 + $0x120] sm:$0xff]  ;;  %s3861_s18 = sshll.u32 %s3921_s22, 4  ;;  %s3862_s18 = int_to_ptr.vmem [resolvable:$false] %s3861_s18 }
  0x1e   : > { %676 = vmatpush1.msra.mxu1 %v514_v11  ;;  %576 = vmatprep.subr.mxu0 %v3237_v12  ;;  %v510_v19 = vld [vmem:[%s5600_s1 + $0x70] sm:$0xff]  ;;  %v509_v21 = vld [vmem:[%s5600_s1 + $0x68] sm:$0xff]  ;;  %v508_v23 = vld [vmem:[%s5600_s1 + $0x60] sm:$0xff]  ;;  %s3863_s26 = scalar_lea.vmem %s3862_s18, 32  ;;  %p3864_p0 = scmp.lt.s32.totalorder %s3160_s24, %s3862_s18 }
  0x1f   : > { %677 = vmatprep.subr.mxu1 %v513_v13  ;;  %577 = vmatpush1.msra.mxu0 %v3236_v14  ;;  %v3231_v24 = vld [vmem:[%s5600_s1 + $0x118] sm:$0xff]  ;;  %v3230_v26 = vld [vmem:[%s5600_s1 + $0x110] sm:$0xff]  ;;  %v3229_v28 = vld [vmem:[%s5600_s1 + $0x108] sm:$0xff]  ;;  %p3865_p1 = scmp.lt.s32.totalorder %s3863_s26, %s3857_s17 }
  0x20   : > { %678 = vmatpush1.msra.mxu1 %v512_v15  ;;  %578 = vmatprep.subr.mxu0 %v3235_v16  ;;  %v507_v25 = vld [vmem:[%s5600_s1 + $0x58] sm:$0xff]  ;;  %v506_v27 = vld [vmem:[%s5600_s1 + $0x50] sm:$0xff]  ;;  %v505_v29 = vld [vmem:[%s5600_s1 + $0x48] sm:$0xff] }
  0x21   : > { %679 = vmatprep.subr.mxu1 %v511_v17  ;;  %579 = vmatpush1.msra.mxu0 %v3234_v18  ;;  %v3228_v30 = vld [vmem:[%s5600_s1 + $0x100] sm:$0xff]  ;;  %v3227_v32 = vld [vmem:[%s5600_s1 + $0xf8] sm:$0xff]  ;;  %v3226_v34 = vld [vmem:[%s5600_s1 + $0xf0] sm:$0xff]  ;;  %p3866_p2 = por %p3865_p1, %p3864_p0 }
  0x22   : > { %680 = vmatpush1.msra.mxu1 %v510_v19  ;;  %580 = vmatprep.subr.mxu0 %v3233_v20  ;;  %v504_v31 = vld [vmem:[%s5600_s1 + $0x40] sm:$0xff]  ;;  %v503_v33 = vld [vmem:[%s5600_s1 + $0x38] sm:$0xff]  ;;  %v502_v35 = vld [vmem:[%s5600_s1 + $0x30] sm:$0xff] }
  0x23   : > { %681 = vmatprep.subr.mxu1 %v509_v21  ;;  %581 = vmatpush1.msra.mxu0 %v3232_v22  ;;  %v3225_v36 = vld [vmem:[%s5600_s1 + $0xe8] sm:$0xff]  ;;  %v3224_v38 = vld [vmem:[%s5600_s1 + $0xe0] sm:$0xff]  ;;  %v3223_v40 = vld [vmem:[%s5600_s1 + $0xd8] sm:$0xff]  ;;  %p3867_p3 = pnand %p3866_p2, %p3860_p13 }
  0x24   : > { %682 = vmatpush1.msra.mxu1 %v508_v23  ;;  %582 = vmatprep.subr.mxu0 %v3231_v24  ;;  %v501_v37 = vld [vmem:[%s5600_s1 + $0x28] sm:$0xff]  ;;  %v500_v39 = vld [vmem:[%s5600_s1 + $0x20] sm:$0xff]  ;;  %v499_v41 = vld [vmem:[%s5600_s1 + $0x18] sm:$0xff] }
  0x25   : > { %683 = vmatprep.subr.mxu1 %v507_v25  ;;  %583 = vmatpush1.msra.mxu0 %v3230_v26  ;;  %v3222_v42 = vld [vmem:[%s5600_s1 + $0xd0] sm:$0xff]  ;;  %v3221_v44 = vld [vmem:[%s5600_s1 + $0xc8] sm:$0xff]  ;;  %v3220_v46 = vld [vmem:[%s5600_s1 + $0xc0] sm:$0xff] }
  0x26   : > { %684 = vmatpush1.msra.mxu1 %v506_v27  ;;  %584 = vmatprep.subr.mxu0 %v3229_v28  ;;  %v498_v43 = vld [vmem:[%s5600_s1 + $0x10] sm:$0xff]  ;;  %v497_v45 = vld [vmem:[%s5600_s1 + $0x8] sm:$0xff]  ;;  %v496_v47 = vld [vmem:[%s5600_s1] sm:$0xff] }
  0x27   : > { %685 = vmatprep.subr.mxu1 %v505_v29  ;;  %585 = vmatpush1.msra.mxu0 %v3228_v30  ;;  %v520_v48 = vld [vmem:[%s4198_s21 + $0x1] sm:$0xff]  ;;  %v3275_v51 = vld [vmem:[%s5600_s1 + $0x238] sm:$0xff]  ;;  %v3274_v53 = vld [vmem:[%s5600_s1 + $0x230] sm:$0xff] }
  0x28   : > { %686 = vmatpush1.msra.mxu1 %v504_v31  ;;  %586 = vmatprep.subr.mxu0 %v3227_v32  ;;  %v492_v49 = vld [vmem:[%s4198_s21] sm:$0xff]  ;;  %v3303_v52 = vld [vmem:[%s5600_s1 + $0x2f8] sm:$0xff]  ;;  %v3302_v54 = vld [vmem:[%s5600_s1 + $0x2f0] sm:$0xff] }
  0x29   : > { %687 = vmatprep.subr.mxu1 %v503_v33  ;;  %587 = vmatpush1.msra.mxu0 %v3226_v34  ;;  %v3273_v55 = vld [vmem:[%s5600_s1 + $0x228] sm:$0xff]  ;;  %v3272_v57 = vld [vmem:[%s5600_s1 + $0x220] sm:$0xff]  ;;  %v3271_v59 = vld [vmem:[%s5600_s1 + $0x218] sm:$0xff] }
  0x2a   : > { %688 = vmatpush1.msra.mxu1 %v502_v35  ;;  %588 = vmatprep.subr.mxu0 %v3225_v36  ;;  %v3301_v56 = vld [vmem:[%s5600_s1 + $0x2e8] sm:$0xff]  ;;  %v3300_v58 = vld [vmem:[%s5600_s1 + $0x2e0] sm:$0xff]  ;;  %v3299_v60 = vld [vmem:[%s5600_s1 + $0x2d8] sm:$0xff] }
  0x2b   : > { %689 = vmatprep.subr.mxu1 %v501_v37  ;;  %589 = vmatpush1.msra.mxu0 %v3224_v38  ;;  %v3270_v61 = vld [vmem:[%s5600_s1 + $0x210] sm:$0xff]  ;;  %v3269_v63 = vld [vmem:[%s5600_s1 + $0x208] sm:$0xff]  ;;  %v3268_v1 = vld [vmem:[%s5600_s1 + $0x200] sm:$0xff] }
  0x2c   : > { %690 = vmatpush1.msra.mxu1 %v500_v39  ;;  %590 = vmatprep.subr.mxu0 %v3223_v40  ;;  %v3298_v62 = vld [vmem:[%s5600_s1 + $0x2d0] sm:$0xff]  ;;  %v3297_v0 = vld [vmem:[%s5600_s1 + $0x2c8] sm:$0xff]  ;;  %v3296_v2 = vld [vmem:[%s5600_s1 + $0x2c0] sm:$0xff] }
  0x2d   : > { %691 = vmatprep.subr.mxu1 %v499_v41  ;;  %591 = vmatpush1.msra.mxu0 %v3222_v42  ;;  %v3267_v3 = vld [vmem:[%s5600_s1 + $0x1f8] sm:$0xff]  ;;  %v3266_v4 = vld [vmem:[%s5600_s1 + $0x1f0] sm:$0xff]  ;;  %v3265_v5 = vld [vmem:[%s5600_s1 + $0x1e8] sm:$0xff] }
  0x2e   : > { %692 = vmatpush1.msra.mxu1 %v498_v43  ;;  %592 = vmatprep.subr.mxu0 %v3221_v44  ;;  %v3295_v6 = vld [vmem:[%s5600_s1 + $0x2b8] sm:$0xff]  ;;  %v521_v7 = vld [vmem:[%s4198_s21 + $0x9] sm:$0xff]  ;;  %v3264_v9 = vld [vmem:[%s5600_s1 + $0x1e0] sm:$0xff] }
  0x2f   : > { %693 = vmatprep.subr.mxu1 %v497_v45  ;;  %593 = vmatpush1.msra.mxu0 %v3220_v46  ;;  %v493_v8 = vld [vmem:[%s4198_s21 + $0x8] sm:$0xff]  ;;  %v3294_v10 = vld [vmem:[%s5600_s1 + $0x2b0] sm:$0xff]  ;;  %v3263_v11 = vld [vmem:[%s5600_s1 + $0x1d8] sm:$0xff] }
  0x30   : > { %694 = vmatpush1.msra.mxu1 %v496_v47  ;;  %727 = vmatprep.mubr.f32.mxu1 %v3919_v50  ;;  %v3293_v12 = vld [vmem:[%s5600_s1 + $0x2a8] sm:$0xff]  ;;  %v3262_v13 = vld [vmem:[%s5600_s1 + $0x1d0] sm:$0xff]  ;;  %v3292_v14 = vld [vmem:[%s5600_s1 + $0x2a0] sm:$0xff] }
  0x31   : > { %3244 = vmatmul.mubr.msk.f32.vlgmr.msra.gmra.mxu0 %vm549_vm0, %v520_v48  ;;  %3248 = vmatmul.mubr.msk.f32.vlgmr.msra.gmra.mxu1 %vm549_vm0, %v492_v49  ;;  %v3261_v15 = vld [vmem:[%s5600_s1 + $0x1c8] sm:$0xff]  ;;  %v3291_v16 = vld [vmem:[%s5600_s1 + $0x298] sm:$0xff]  ;;  %v494_v18 = vld [vmem:[%s4198_s21 + $0x10] sm:$0xff] }
  0x32   : > { %801 = vmatprep.subr.mxu0 %v3275_v51  ;;  %939 = vmatprep.subr.mxu1 %v3303_v52  ;;  %v522_v17 = vld [vmem:[%s4198_s21 + $0x11] sm:$0xff]  ;;  %v3260_v19 = vld [vmem:[%s5600_s1 + $0x1c0] sm:$0xff]  ;;  %v3289_v22 = vld [vmem:[%s5600_s1 + $0x288] sm:$0xff] }
  0x33   : > { %802 = vmatpush1.msra.mxu0 %v3274_v53  ;;  %940 = vmatpush1.msra.mxu1 %v3302_v54  ;;  %v3290_v20 = vld [vmem:[%s5600_s1 + $0x290] sm:$0xff]  ;;  %v3259_v21 = vld [vmem:[%s5600_s1 + $0x1b8] sm:$0xff]  ;;  %v3288_v24 = vld [vmem:[%s5600_s1 + $0x280] sm:$0xff] }
  0x34   : > { %803 = vmatprep.subr.mxu0 %v3273_v55  ;;  %941 = vmatprep.subr.mxu1 %v3301_v56  ;;  %v3258_v23 = vld [vmem:[%s5600_s1 + $0x1b0] sm:$0xff]  ;;  %v3257_v25 = vld [vmem:[%s5600_s1 + $0x1a8] sm:$0xff]  ;;  %v3287_v26 = vld [vmem:[%s5600_s1 + $0x278] sm:$0xff] }
  0x35   : > { %804 = vmatpush1.msra.mxu0 %v3272_v57  ;;  %942 = vmatpush1.msra.mxu1 %v3300_v58  ;;  %v523_v27 = vld [vmem:[%s4198_s21 + $0x19] sm:$0xf]  ;;  %v3256_v29 = vld [vmem:[%s5600_s1 + $0x1a0] sm:$0xff]  ;;  %v3286_v30 = vld [vmem:[%s5600_s1 + $0x270] sm:$0xff] }
  0x36   : > { %805 = vmatprep.subr.mxu0 %v3271_v59  ;;  %943 = vmatprep.subr.mxu1 %v3299_v60  ;;  %v495_v28 = vld [vmem:[%s4198_s21 + $0x18] sm:$0xf]  ;;  %v3285_v32 = vld [vmem:[%s5600_s1 + $0x268] sm:$0xff]  ;;  %v3254_v33 = vld [vmem:[%s5600_s1 + $0x190] sm:$0xff] }
  0x37   : > { %806 = vmatpush1.msra.mxu0 %v3270_v61  ;;  %944 = vmatpush1.msra.mxu1 %v3298_v62  ;;  %v3255_v31 = vld [vmem:[%s5600_s1 + $0x198] sm:$0xff]  ;;  %v3284_v34 = vld [vmem:[%s5600_s1 + $0x260] sm:$0xff]  ;;  %v3253_v35 = vld [vmem:[%s5600_s1 + $0x188] sm:$0xff] }
  0x38   : > { %807 = vmatprep.subr.mxu0 %v3269_v63  ;;  %945 = vmatprep.subr.mxu1 %v3297_v0  ;;  %v3283_v36 = vld [vmem:[%s5600_s1 + $0x258] sm:$0xff]  ;;  %v3252_v37 = vld [vmem:[%s5600_s1 + $0x180] sm:$0xff]  ;;  %v3282_v38 = vld [vmem:[%s5600_s1 + $0x250] sm:$0xff] }
  0x39   : > { %808 = vmatpush1.msra.mxu0 %v3268_v1  ;;  %946 = vmatpush1.msra.mxu1 %v3296_v2  ;;  %v752_v39 = vld [vmem:[%s4198_s21 + $0x2] sm:$0xff]  ;;  %v3331_v41 = vld [vmem:[%s5600_s1 + $0x3b8] sm:$0xff]  ;;  %v3330_v43 = vld [vmem:[%s5600_s1 + $0x3b0] sm:$0xff] }
  0x3a   : > { %809 = vmatprep.subr.mxu0 %v3267_v3  ;;  %632 = vmatprep.mubr.f32.mxu0 %v3919_v50  ;;  %v3281_v40 = vld [vmem:[%s5600_s1 + $0x248] sm:$0xff]  ;;  %v3280_v42 = vld [vmem:[%s5600_s1 + $0x240] sm:$0xff]  ;;  %v3327_v48 = vld [vmem:[%s5600_s1 + $0x398] sm:$0xff] }
  0x3b   : > { %810 = vmatpush1.msra.mxu0 %v3266_v4  ;;  %733 = vmatprep.mubr.f32.mxu1 %v3919_v50  ;;  %v890_v44 = vld [vmem:[%s4198_s21 + $0x3] sm:$0xff]  ;;  %v3326_v49 = vld [vmem:[%s5600_s1 + $0x390] sm:$0xff]  ;;  %v3323_v55 = vld [vmem:[%s5600_s1 + $0x378] sm:$0xff] }
  0x3c   : > { %811 = vmatprep.subr.mxu0 %v3265_v5  ;;  %947 = vmatprep.subr.mxu1 %v3295_v6  ;;  %v3329_v45 = vld [vmem:[%s5600_s1 + $0x3a8] sm:$0xff]  ;;  %v3328_v46 = vld [vmem:[%s5600_s1 + $0x3a0] sm:$0xff]  ;;  %v754_v54 = vld [vmem:[%s4198_s21 + $0x12] sm:$0xff] }
  0x3d   : > { %3245 = vmatmul.mubr.msk.f32.gmra.mxu0 %vm549_vm0, %v521_v7  ;;  %3249 = vmatmul.mubr.msk.f32.gmra.mxu1 %vm549_vm0, %v493_v8  ;;  %v753_v47 = vld [vmem:[%s4198_s21 + $0xa] sm:$0xff]  ;;  %v3324_v53 = vld [vmem:[%s5600_s1 + $0x380] sm:$0xff]  ;;  %v892_v57 = vld [vmem:[%s4198_s21 + $0x13] sm:$0xff] }
  0x3e   : > { %812 = vmatpush1.msra.mxu0 %v3264_v9  ;;  %948 = vmatpush1.msra.mxu1 %v3294_v10  ;;  %v891_v51 = vld [vmem:[%s4198_s21 + $0xb] sm:$0xff]  ;;  %v3320_v59 = vld [vmem:[%s5600_s1 + $0x360] sm:$0xff]  ;;  %v755_v60 = vld [vmem:[%s4198_s21 + $0x1a] sm:$0xf] }
  0x3f   : > { %813 = vmatprep.subr.mxu0 %v3263_v11  ;;  %949 = vmatprep.subr.mxu1 %v3293_v12  ;;  %v3325_v52 = vld [vmem:[%s5600_s1 + $0x388] sm:$0xff]  ;;  %v3322_v56 = vld [vmem:[%s5600_s1 + $0x370] sm:$0xff]  ;;  %v3319_v61 = vld [vmem:[%s5600_s1 + $0x358] sm:$0xff] }
  0x40   : > { %814 = vmatpush1.msra.mxu0 %v3262_v13  ;;  %950 = vmatpush1.msra.mxu1 %v3292_v14  ;;  %v3321_v58 = vld [vmem:[%s5600_s1 + $0x368] sm:$0xff]  ;;  %v3318_v62 = vld [vmem:[%s5600_s1 + $0x350] sm:$0xff]  ;;  %v893_v63 = vld [vmem:[%s4198_s21 + $0x1b] sm:$0xf] }
  0x41   : > { %638 = vmatprep.mubr.f32.mxu0 %v3919_v50  ;;  %739 = vmatprep.mubr.f32.mxu1 %v3919_v50  ;;  %v3317_v0 = vld [vmem:[%s5600_s1 + $0x348] sm:$0xff]  ;;  %v3316_v1 = vld [vmem:[%s5600_s1 + $0x340] sm:$0xff]  ;;  %v3315_v2 = vld [vmem:[%s5600_s1 + $0x338] sm:$0xff] }
  0x42   : > { %815 = vmatprep.subr.mxu0 %v3261_v15  ;;  %951 = vmatprep.subr.mxu1 %v3291_v16  ;;  %v3314_v3 = vld [vmem:[%s5600_s1 + $0x330] sm:$0xff]  ;;  %v3313_v4 = vld [vmem:[%s5600_s1 + $0x328] sm:$0xff]  ;;  %v3312_v5 = vld [vmem:[%s5600_s1 + $0x320] sm:$0xff] }
  0x43   : > { %3246 = vmatmul.mubr.msk.f32.gmra.mxu0 %vm549_vm0, %v522_v17  ;;  %3250 = vmatmul.mubr.msk.f32.gmra.mxu1 %vm549_vm0, %v494_v18  ;;  %v3311_v6 = vld [vmem:[%s5600_s1 + $0x318] sm:$0xff]  ;;  %v3310_v7 = vld [vmem:[%s5600_s1 + $0x310] sm:$0xff]  ;;  %v3309_v8 = vld [vmem:[%s5600_s1 + $0x308] sm:$0xff] }
  0x44   : > { %816 = vmatpush1.msra.mxu0 %v3260_v19  ;;  %952 = vmatpush1.msra.mxu1 %v3290_v20  ;;  %v3308_v9 = vld [vmem:[%s5600_s1 + $0x300] sm:$0xff]  ;;  %v1029_v11 = vld [vmem:[%s4198_s21 + $0xc] sm:$0xff]  ;;  %v1030_v12 = vld [vmem:[%s4198_s21 + $0x14] sm:$0xff] }
  0x45   : > { %817 = vmatprep.subr.mxu0 %v3259_v21  ;;  %953 = vmatprep.subr.mxu1 %v3289_v22  ;;  %v1028_v10 = vld [vmem:[%s4198_s21 + $0x4] sm:$0xff]  ;;  %v1031_v13 = vld [vmem:[%s4198_s21 + $0x1c] sm:$0xf]  ;;  %v1391_v15 = vld [vmem:[%s5603_s4 + $0x70] sm:$0xff] }
  0x46   : > { %818 = vmatpush1.msra.mxu0 %v3258_v23  ;;  %954 = vmatpush1.msra.mxu1 %v3288_v24  ;;  %v1392_v14 = vld [vmem:[%s5603_s4 + $0x78] sm:$0xff]  ;;  %v1390_v16 = vld [vmem:[%s5603_s4 + $0x68] sm:$0xff]  ;;  %v1389_v17 = vld [vmem:[%s5603_s4 + $0x60] sm:$0xff] }
  0x47   : > { %644 = vmatprep.mubr.f32.mxu0 %v3919_v50  ;;  %745 = vmatprep.mubr.f32.mxu1 %v3919_v50  ;;  %v1388_v18 = vld [vmem:[%s5603_s4 + $0x58] sm:$0xff]  ;;  %v1387_v19 = vld [vmem:[%s5603_s4 + $0x50] sm:$0xff]  ;;  %v1386_v20 = vld [vmem:[%s5603_s4 + $0x48] sm:$0xff] }
  0x48   : > { %819 = vmatprep.subr.mxu0 %v3257_v25  ;;  %955 = vmatprep.subr.mxu1 %v3287_v26  ;;  %v1385_v21 = vld [vmem:[%s5603_s4 + $0x40] sm:$0xff]  ;;  %v1384_v22 = vld [vmem:[%s5603_s4 + $0x38] sm:$0xff]  ;;  %v1383_v23 = vld [vmem:[%s5603_s4 + $0x30] sm:$0xff] }
  0x49   : > { %3247 = vmatmul.mubr.msk.f32.gmra.mxu0 %vm549_vm0, %v523_v27  ;;  %3251 = vmatmul.mubr.msk.f32.gmra.mxu1 %vm549_vm0, %v495_v28  ;;  %v1382_v24 = vld [vmem:[%s5603_s4 + $0x28] sm:$0xff]  ;;  %v1381_v25 = vld [vmem:[%s5603_s4 + $0x20] sm:$0xff]  ;;  %v1380_v26 = vld [vmem:[%s5603_s4 + $0x18] sm:$0xff] }
  0x4a   : > { %820 = vmatpush1.msra.mxu0 %v3256_v29  ;;  %956 = vmatpush1.msra.mxu1 %v3286_v30  ;;  %v1379_v27 = vld [vmem:[%s5603_s4 + $0x10] sm:$0xff] }
  0x4b   : > { %821 = vmatprep.subr.mxu0 %v3255_v31  ;;  %957 = vmatprep.subr.mxu1 %v3285_v32 }
  0x4c   : > { %822 = vmatpush1.msra.mxu0 %v3254_v33  ;;  %958 = vmatpush1.msra.mxu1 %v3284_v34 }
  0x4d   : > { %823 = vmatprep.subr.mxu0 %v3253_v35  ;;  %959 = vmatprep.subr.mxu1 %v3283_v36 }
  0x4e   : > { %824 = vmatpush1.msra.mxu0 %v3252_v37  ;;  %857 = vmatprep.mubr.f32.mxu0 %v3919_v50 }
  0x4f   : > { %960 = vmatpush1.msra.mxu1 %v3282_v38  ;;  %3276 = vmatmul.mubr.msk.f32.vlgmr.msra.gmra.mxu0 %vm549_vm0, %v752_v39 }
  0x50   : > { %961 = vmatprep.subr.mxu1 %v3281_v40  ;;  %1077 = vmatprep.subr.mxu0 %v3331_v41 }
  0x51   : > { %962 = vmatpush1.msra.mxu1 %v3280_v42  ;;  %995 = vmatprep.mubr.f32.mxu1 %v3919_v50 }
  0x52   : > { %1078 = vmatpush1.msra.mxu0 %v3330_v43  ;;  %3304 = vmatmul.mubr.msk.f32.vlgmr.msra.gmra.mxu1 %vm549_vm0, %v890_v44 }
  0x53   : > { %1079 = vmatprep.subr.mxu0 %v3329_v45  ;;  %863 = vmatprep.mubr.f32.mxu0 %v3919_v50 }
  0x54   : > { %1080 = vmatpush1.msra.mxu0 %v3328_v46  ;;  %1001 = vmatprep.mubr.f32.mxu1 %v3919_v50 }
  0x55   : > { %3277 = vmatmul.mubr.msk.f32.gmra.mxu0 %vm549_vm0, %v753_v47  ;;  %1081 = vmatprep.subr.mxu0 %v3327_v48 }
  0x56   : > { %1082 = vmatpush1.msra.mxu0 %v3326_v49  ;;  %3305 = vmatmul.mubr.msk.f32.gmra.mxu1 %vm549_vm0, %v891_v51 }
  0x57   : > { %1083 = vmatprep.subr.mxu0 %v3325_v52  ;;  %869 = vmatprep.mubr.f32.mxu0 %v3919_v50 }
  0x58   : > { %1084 = vmatpush1.msra.mxu0 %v3324_v53  ;;  %1007 = vmatprep.mubr.f32.mxu1 %v3919_v50 }
  0x59   : > { %3278 = vmatmul.mubr.msk.f32.gmra.mxu0 %vm549_vm0, %v754_v54  ;;  %1085 = vmatprep.subr.mxu0 %v3323_v55 }
  0x5a   : > { %1086 = vmatpush1.msra.mxu0 %v3322_v56  ;;  %3306 = vmatmul.mubr.msk.f32.gmra.mxu1 %vm549_vm0, %v892_v57 }
  0x5b   : > { %1087 = vmatprep.subr.mxu0 %v3321_v58  ;;  %875 = vmatprep.mubr.f32.mxu0 %v3919_v50 }
  0x5c   : > { %1088 = vmatpush1.msra.mxu0 %v3320_v59  ;;  %1013 = vmatprep.mubr.f32.mxu1 %v3919_v50 }
  0x5d   : > { %3279 = vmatmul.mubr.msk.f32.gmra.mxu0 %vm549_vm0, %v755_v60  ;;  %1089 = vmatprep.subr.mxu0 %v3319_v61  ;;  %v1168_v60 = vlaneseq }
  0x5e   : > { %1090 = vmatpush1.msra.mxu0 %v3318_v62  ;;  %3307 = vmatmul.mubr.msk.f32.gmra.mxu1 %vm549_vm0, %v893_v63 }
  0x5f   : > { %1091 = vmatprep.subr.mxu0 %v3317_v0  ;;  %1133 = vmatprep.mubr.f32.mxu0 %v3919_v50 }
  0x60   : > { %1092 = vmatpush1.msra.mxu0 %v3316_v1  ;;  %1274 = vmatprep.mubr.f32.mxu1 %v3919_v50 }
  0x61   : > { %1093 = vmatprep.subr.mxu0 %v3315_v2 }
  0x62   : > { %1094 = vmatpush1.msra.mxu0 %v3314_v3  ;;  %v4540_v3 = vshrl.u32 %v1168_v60, 7 }
  0x63   : > { %1095 = vmatprep.subr.mxu0 %v3313_v4 }
  0x64   : > { %1096 = vmatpush1.msra.mxu0 %v3312_v5 }
  0x65   : > { %1097 = vmatprep.subr.mxu0 %v3311_v6 }
  0x66   : > { %1098 = vmatpush1.msra.mxu0 %v3310_v7 }
  0x67   : > { %1099 = vmatprep.subr.mxu0 %v3309_v8 }
  0x68   : > { %1100 = vmatpush1.msra.mxu0 %v3308_v9 }
  0x69   : > { %3332 = vmatmul.mubr.msk.f32.vlgmr.msra.gmra.mxu0 %vm549_vm0, %v1028_v10  ;;  %1405 = vmatprep.subr.mxu0 %v3919_v50 }
  0x6a   : > { %1139 = vmatprep.mubr.f32.mxu0 %v3919_v50  ;;  %1406 = vmatpush1.msra.mxu0 %v1392_v14 }
  0x6b   : > { %1407 = vmatprep.subr.mxu0 %v3919_v50 }
  0x6c   : > { %1408 = vmatpush1.msra.mxu0 %v1391_v15 }
  0x6d   : > { %3333 = vmatmul.mubr.msk.f32.gmra.mxu0 %vm549_vm0, %v1029_v11  ;;  %1409 = vmatprep.subr.mxu0 %v3919_v50 }
  0x6e   : > { %1145 = vmatprep.mubr.f32.mxu0 %v3919_v50  ;;  %1410 = vmatpush1.msra.mxu0 %v1390_v16 }
  0x6f   : > { %1411 = vmatprep.subr.mxu0 %v3919_v50 }
  0x70   : > { %1412 = vmatpush1.msra.mxu0 %v1389_v17 }
  0x71   : > { %3334 = vmatmul.mubr.msk.f32.gmra.mxu0 %vm549_vm0, %v1030_v12  ;;  %1413 = vmatprep.subr.mxu0 %v3919_v50 }
  0x72   : > { %1151 = vmatprep.mubr.f32.mxu0 %v3919_v50  ;;  %1414 = vmatpush1.msra.mxu0 %v1388_v18  ;;  %v1170_v18 = vsub.s32 0, %v4540_v3 }
  0x73   : > { %1415 = vmatprep.subr.mxu0 %v3919_v50 }
  0x74   : > { %1416 = vmatpush1.msra.mxu0 %v1387_v19 }
  0x75   : > { %3335 = vmatmul.mubr.msk.f32.gmra.mxu0 %vm549_vm0, %v1031_v13  ;;  %1417 = vmatprep.subr.mxu0 %v3919_v50 }
  0x76   : > { %1418 = vmatpush1.msra.mxu0 %v1386_v20 }
  0x77   : > { %1419 = vmatprep.subr.mxu0 %v3919_v50 }
  0x78   : > { %1420 = vmatpush1.msra.mxu0 %v1385_v21 }
  0x79   : > { %1421 = vmatprep.subr.mxu0 %v3919_v50 }
  0x7a   : > { %1422 = vmatpush1.msra.mxu0 %v1384_v22 }
  0x7b   : > { %1423 = vmatprep.subr.mxu0 %v3919_v50 }
  0x7c   : > { %1424 = vmatpush1.msra.mxu0 %v1383_v23  ;;  %v1166_v23 = vld [vmem:[%s5601_s2] sm:$0x3] }
  0x7d   : > { %1425 = vmatprep.subr.mxu0 %v3919_v50 }
  0x7e   : > { %1426 = vmatpush1.msra.mxu0 %v1382_v24  ;;  %v1174_v24 = vsub.s32 1, %v4540_v3  ;;  %v3482_v3 = vld [vmem:[%s5606_s7 + $0x8] sm:$0x1f] }
  0x7f   : > { %1427 = vmatprep.subr.mxu0 %v3919_v50 }
  0x80   : > { %1428 = vmatpush1.msra.mxu0 %v1381_v25 }
  0x81   : > { %1429 = vmatprep.subr.mxu0 %v3919_v50 }
  0x82   : > { %1430 = vmatpush1.msra.mxu0 %v1380_v26 }
  0x83   : > { %1431 = vmatprep.subr.mxu0 %v3919_v50 }
  0x84   : > { %1432 = vmatpush1.msra.mxu0 %v1379_v27 }
  0x85   : > { %1433 = vmatprep.subr.mxu0 %v3919_v50 }
  0xf1   : > { %v628_v28 = vpop.f32.mrf.mxu0  ;;  %v729_v29 = vpop.f32.mrf.mxu1 }
  0xf2   : > { %v730_v15 = vadd.f32 %v729_v29, %v628_v28 }
  0xf3   : > { %v630_v30 = vpop.f32.mrf.mxu0  ;;  %v731_v32 = vpop.f32.mrf.mxu1 }
  0xf4   : > { %v732_v12 = vadd.f32 %v731_v32, %v630_v30 }
  0xfd   : > { %v634_v31 = vpop.f32.mrf.mxu0  ;;  %v735_v34 = vpop.f32.mrf.mxu1 }
  0xfe   : > { %v736_v9 = vadd.f32 %v735_v34, %v634_v31 }
  0xff   : > { %v636_v33 = vpop.f32.mrf.mxu0  ;;  %v737_v36 = vpop.f32.mrf.mxu1 }
 0x100   : > { %v738_v5 = vadd.f32 %v737_v36, %v636_v33  ;;  %v1171_v33 = vrot.slane %v1166_v23, %v1170_v18 }
 0x103   : > { %v640_v35 = vpop.f32.mrf.mxu0  ;;  %v741_v38 = vpop.f32.mrf.mxu1 }
 0x104   : > { %v742_v1 = vadd.f32 %v741_v38, %v640_v35 }
 0x105   : > { %v642_v37 = vpop.f32.mrf.mxu0  ;;  %v743_v41 = vpop.f32.mrf.mxu1 }
 0x106   : > { %v744_v63 = vadd.f32 %v743_v41, %v642_v37  ;;  %v1175_v37 = vrot.slane %v1166_v23, %v1174_v24  ;;  %v1396_v23 = vld [vmem:[%s5603_s4 + $0x98] sm:$0xff] }
 0x109   : > { %v646_v39 = vpop.f32.mrf.mxu0  ;;  %v747_v43 = vpop.f32.mrf.mxu1 }
 0x10a   : > { %v748_v0 = vadd.f32 %v747_v43, %v646_v39 }
 0x10b   : > { %v648_v40 = vpop.f32.mrf.mxu0  ;;  %v749_v45 = vpop.f32.mrf.mxu1 }
 0x10c   : > { %v750_v6 = vadd.f32 %v749_v45, %v648_v40 }
 0x10f   : > { %v859_v42 = vpop.f32.mrf.mxu0 }
 0x110   : > { %v882_v25 = vadd.f32 %v859_v42, %v730_v15  ;;  %v3350_v15 = vld [vmem:[%s5603_s4 + $0xb8] sm:$0xff] }
 0x111   : > { %v861_v44 = vpop.f32.mrf.mxu0 }
 0x112   : > { %v997_v47 = vpop.f32.mrf.mxu1  ;;  %v883_v20 = vadd.f32 %v861_v44, %v732_v12  ;;  %v3353_v12 = vld [vmem:[%s5603_s4 + $0xd0] sm:$0xff] }
 0x113   : > { %v1020_v40 = vadd.f32 %v997_v47, %v882_v25  ;;  %v3367_v25 = vld [vmem:[%s5603_s4 + $0x140] sm:$0xff] }
 0x114   : > { %v999_v49 = vpop.f32.mrf.mxu1 }
 0x115   : > { %v865_v46 = vpop.f32.mrf.mxu0  ;;  %v1021_v36 = vadd.f32 %v999_v49, %v883_v20  ;;  %v3348_v20 = vld [vmem:[%s5603_s4 + $0xa8] sm:$0xff] }
 0x116   : > { %v1003_v52 = vpop.f32.mrf.mxu1  ;;  %v884_v16 = vadd.f32 %v865_v46, %v736_v9  ;;  %v3356_v9 = vld [vmem:[%s5603_s4 + $0xe8] sm:$0xff] }
 0x117   : > { %v867_v48 = vpop.f32.mrf.mxu0 }
 0x118   : > { %v1005_v54 = vpop.f32.mrf.mxu1  ;;  %v885_v13 = vadd.f32 %v867_v48, %v738_v5  ;;  %v1022_v32 = vadd.f32 %v1003_v52, %v884_v16  ;;  %v3360_v5 = vld [vmem:[%s5603_s4 + $0x108] sm:$0xff] }
 0x119   : > { %v871_v51 = vpop.f32.mrf.mxu0  ;;  %v1378_v16 = vld [vmem:[%s5603_s4 + $0x8] sm:$0xff] }
 0x11a   : > { %v1009_v56 = vpop.f32.mrf.mxu1  ;;  %v886_v10 = vadd.f32 %v871_v51, %v742_v1  ;;  %v1023_v30 = vadd.f32 %v1005_v54, %v885_v13  ;;  %v3362_v1 = vld [vmem:[%s5603_s4 + $0x118] sm:$0xff]  ;;  %v3352_v13 = vld [vmem:[%s5603_s4 + $0xc8] sm:$0xff]  ;;  %1434 = vmatpush1.msra.mxu0 %v1378_v16  ;;  %v3377_v16 = vld [vmem:[%s5604_s5 + $0xe0] sm:$0xff] }
 0x11b   : > { %v873_v53 = vpop.f32.mrf.mxu0  ;;  %1435 = vmatprep.subr.mxu0 %v3919_v50 }
 0x11c   : > { %v1011_v59 = vpop.f32.mrf.mxu1  ;;  %v887_v7 = vadd.f32 %v873_v53, %v744_v63  ;;  %v1024_v26 = vadd.f32 %v1009_v56, %v886_v10  ;;  %v3340_v63 = vld [vmem:[%s5602_s3 + $0x10] sm:$0xff]  ;;  %v3355_v10 = vld [vmem:[%s5603_s4 + $0xe0] sm:$0xff] }
 0x11d   : > { %v877_v55 = vpop.f32.mrf.mxu0 }
 0x11e   : > { %v1015_v2 = vpop.f32.mrf.mxu1  ;;  %v888_v8 = vadd.f32 %v877_v55, %v748_v0  ;;  %v1025_v21 = vadd.f32 %v1011_v59, %v887_v7  ;;  %v3363_v0 = vld [vmem:[%s5603_s4 + $0x120] sm:$0xff]  ;;  %v3358_v7 = vld [vmem:[%s5603_s4 + $0xf8] sm:$0xff] }
 0x11f   : > { %v879_v57 = vpop.f32.mrf.mxu0 }
 0x120   : > { %v889_v14 = vadd.f32 %v879_v57, %v750_v6  ;;  %v1017_v17 = vpop.f32.mrf.mxu1  ;;  %v1026_v22 = vadd.f32 %v1015_v2, %v888_v8  ;;  %v3341_v2 = vld [vmem:[%s5602_s3 + $0x18] sm:$0x3f]  ;;  %v3359_v6 = vld [vmem:[%s5603_s4 + $0x100] sm:$0xff]  ;;  %v3357_v8 = vld [vmem:[%s5603_s4 + $0xf0] sm:$0xff] }
 0x122   : > { %v1027_v31 = vadd.f32 %v1017_v17, %v889_v14  ;;  %v3351_v14 = vld [vmem:[%s5603_s4 + $0xc0] sm:$0xff]  ;;  %v3349_v17 = vld [vmem:[%s5603_s4 + $0xb0] sm:$0xff] }
 0x129   : > { %v1135_v58 = vpop.f32.mrf.mxu0 }
 0x12a   : > { %v1158_v46 = vadd.f32 %v1135_v58, %v1020_v40 }
 0x12b   : > { %v1137_v61 = vpop.f32.mrf.mxu0 }
 0x12c   : > { %v1159_v43 = vadd.f32 %v1137_v61, %v1021_v36  ;;  %v1178_v56 = vadd.f32 %v1171_v33, %v1158_v46  ;;  %v1194_v61 = vld [vmem:[%s5602_s3] sm:$0xff]  ;;  %v3390_v46 = vld [vmem:[%s5604_s5 + $0x148] sm:$0xff] }
 0x12d   : > { %v1141_v62 = vpop.f32.mrf.mxu0 }
 0x12e   : > { %v1160_v41 = vadd.f32 %v1141_v62, %v1022_v32  ;;  %v1179_v55 = vadd.f32 %v1175_v37, %v1159_v43  ;;  %v1186_v58 = vmax.f32 %v1178_v56, 0.0  ;;  %v1195_v62 = vld [vmem:[%s5602_s3 + $0x8] sm:$0x3f]  ;;  %v1605_v43 = vld [vmem:[%s5604_s5 + $0xa0] sm:$0xf] }
 0x12f   : > { %v1143_v4 = vpop.f32.mrf.mxu0  ;;  %v1606_v32 = vld [vmem:[%s5604_s5 + $0xa8] sm:$0xf]  ;;  %v1601_v56 = vld [vmem:[%s5604_s5 + $0x80] sm:$0xff] }
 0x130   : > { %v1161_v38 = vadd.f32 %v1143_v4, %v1023_v30  ;;  %v1180_v53 = vadd.f32 %v1171_v33, %v1160_v41  ;;  %v1187_v60 = vmax.f32 %v1179_v55, 0.0  ;;  %v3361_v4 = vld [vmem:[%s5603_s4 + $0x110] sm:$0xff]  ;;  %v1394_v30 = vld [vmem:[%s5603_s4 + $0x88] sm:$0xff] }
 0x131   : > { %v1147_v11 = vpop.f32.mrf.mxu0  ;;  %v1602_v55 = vld [vmem:[%s5604_s5 + $0x88] sm:$0xff] }
 0x132   : > { %v1162_v34 = vadd.f32 %v1147_v11, %v1024_v26  ;;  %v1181_v51 = vadd.f32 %v1175_v37, %v1161_v38  ;;  %v1188_v59 = vmax.f32 %v1180_v53, 0.0  ;;  %v3354_v11 = vld [vmem:[%s5603_s4 + $0xd8] sm:$0xff]  ;;  %v1395_v26 = vld [vmem:[%s5603_s4 + $0x90] sm:$0xff] }
 0x133   : > { %v1149_v19 = vpop.f32.mrf.mxu0  ;;  %v1603_v53 = vld [vmem:[%s5604_s5 + $0x90] sm:$0xff] }
 0x134   : > { %v1163_v28 = vadd.f32 %v1149_v19, %v1025_v21  ;;  %v1182_v48 = vadd.f32 %v1171_v33, %v1162_v34  ;;  %v1189_v47 = vmax.f32 %v1181_v51, 0.0  ;;  %v1377_v19 = vld [vmem:[%s5603_s4] sm:$0xff] }
 0x135   : > { %v1153_v27 = vpop.f32.mrf.mxu0  ;;  %1436 = vmatpush1.msra.mxu0 %v1377_v19  ;;  %v1397_v21 = vld [vmem:[%s5603_s4 + $0xa0] sm:$0xff]  ;;  %v3376_v19 = vld [vmem:[%s5604_s5 + $0xd8] sm:$0xff] }
 0x136   : > { %v1164_v29 = vadd.f32 %v1153_v27, %v1026_v22  ;;  %v1183_v44 = vadd.f32 %v1175_v37, %v1163_v28  ;;  %v1190_v57 = vmax.f32 %v1182_v48, 0.0  ;;  %1459 = vmatprep.subr.mxu0 %v3919_v50  ;;  %v3368_v22 = vld [vmem:[%s5603_s4 + $0x148] sm:$0xff]  ;;  %v3366_v27 = vld [vmem:[%s5603_s4 + $0x138] sm:$0xff]  ;;  %v1393_v28 = vld [vmem:[%s5603_s4 + $0x80] sm:$0xff] }
 0x137   : > { %v1155_v35 = vpop.f32.mrf.mxu0  ;;  %1460 = vmatpush2.msra.mxu0 %v1397_v21  ;;  %v3375_v21 = vld [vmem:[%s5604_s5 + $0xd0] sm:$0xff] }
 0x138   : > { %v1165_v39 = vadd.f32 %v1155_v35, %v1027_v31  ;;  %v1184_v42 = vadd.f32 %v1171_v33, %v1164_v29  ;;  %v1191_v49 = vmax.f32 %v1183_v44, 0.0  ;;  %1461 = vmatprep.subr.mxu0 %v3919_v50  ;;  %v3365_v31 = vld [vmem:[%s5603_s4 + $0x130] sm:$0xff]  ;;  %v3364_v29 = vld [vmem:[%s5603_s4 + $0x128] sm:$0xff]  ;;  %v3392_v33 = vld [vmem:[%s5604_s5 + $0x158] sm:$0xf] }
 0x139   : > { %1462 = vmatpush2.msra.mxu0 %v1396_v23  ;;  %v3391_v44 = vld [vmem:[%s5604_s5 + $0x150] sm:$0xf]  ;;  %v3374_v23 = vld [vmem:[%s5604_s5 + $0xc8] sm:$0xff] }
 0x13a   : > { %v1185_v45 = vadd.f32 %v1175_v37, %v1165_v39  ;;  %v1192_v54 = vmax.f32 %v1184_v42, 0.0  ;;  %1463 = vmatprep.subr.mxu0 %v3919_v50 }
 0x13b   : > { %1464 = vmatpush2.msra.mxu0 %v1395_v26  ;;  %v3373_v26 = vld [vmem:[%s5604_s5 + $0xc0] sm:$0xff] }
 0x13c   : > { %v1193_v52 = vmax.f32 %v1185_v45, 0.0  ;;  %1465 = vmatprep.subr.mxu0 %v3919_v50  ;;  %v1604_v45 = vld [vmem:[%s5604_s5 + $0x98] sm:$0xff] }
 0x13d   : > { %1466 = vmatpush2.msra.mxu0 %v1394_v30  ;;  %v3371_v30 = vld [vmem:[%s5604_s5 + $0xb0] sm:$0xff] }
 0x13e   : > { %3336 = vmatprep.subr.msk.mxu1 %vm1203_vm1, %v1193_v52  ;;  %1467 = vmatprep.subr.mxu0 %v3919_v50 }
 0x13f   : > { %3337 = vmatpush1.msk.msra.mxu1 %vm1203_vm1, %v1192_v54  ;;  %1468 = vmatpush2.msra.mxu0 %v1393_v28 }
 0x140   : > { %1236 = vmatprep.subr.mxu1 %v1191_v49  ;;  %3393 = vmatprep.subr.msk.mxu0 %vm1203_vm1, %v3392_v33 }
 0x141   : > { %1237 = vmatpush1.msra.mxu1 %v1190_v57 }
 0x142   : > { %1238 = vmatprep.subr.mxu1 %v1189_v47 }
 0x143   : > { %1239 = vmatpush1.msra.mxu1 %v1188_v59 }
 0x144   : > { %1240 = vmatprep.subr.mxu1 %v1187_v60 }
 0x145   : > { %1241 = vmatpush1.msra.mxu1 %v1186_v58 }
 0x146   : > { %3338 = vmatmul.mubr.msk.f32.vlgmr.msra.gmra.mxu1 %vm1196_vm2, %v1194_v61  ;;  %3342 = vmatprep.subr.msk.mxu1 %vm1203_vm1, %v1193_v52  ;;  %v1598_v61 = vld [vmem:[%s5604_s5 + $0x68] sm:$0xff] }
 0x147   : > { %3343 = vmatpush1.msk.msra.mxu1 %vm1203_vm1, %v1192_v54  ;;  %1280 = vmatprep.mubr.f32.mxu1 %v3919_v50  ;;  %v3389_v54 = vld [vmem:[%s5604_s5 + $0x140] sm:$0xff] }
 0x148   : > { %1322 = vmatprep.subr.mxu1 %v1191_v49  ;;  %v3388_v49 = vld [vmem:[%s5604_s5 + $0x138] sm:$0xff] }
 0x149   : > { %1323 = vmatpush1.msra.mxu1 %v1190_v57  ;;  %v3387_v57 = vld [vmem:[%s5604_s5 + $0x130] sm:$0xff] }
 0x14a   : > { %3339 = vmatmul.mubr.msk.f32.gmra.mxu1 %vm1196_vm2, %v1195_v62  ;;  %1324 = vmatprep.subr.mxu1 %v1189_v47  ;;  %v1600_v47 = vld [vmem:[%s5604_s5 + $0x78] sm:$0xff]  ;;  %v1597_v62 = vld [vmem:[%s5604_s5 + $0x60] sm:$0xff] }
 0x14b   : > { %1325 = vmatpush1.msra.mxu1 %v1188_v59  ;;  %1360 = vmatprep.mubr.f32.mxu1 %v3919_v50  ;;  %v3386_v59 = vld [vmem:[%s5604_s5 + $0x128] sm:$0xff] }
 0x14c   : > { %1326 = vmatprep.subr.mxu1 %v1187_v60  ;;  %v1599_v60 = vld [vmem:[%s5604_s5 + $0x70] sm:$0xff] }
 0x14d   : > { %1327 = vmatpush1.msra.mxu1 %v1186_v58  ;;  %v3385_v58 = vld [vmem:[%s5604_s5 + $0x120] sm:$0xff] }
 0x14e   : > { %3344 = vmatmul.mubr.msk.f32.vlgmr.msra.gmra.mxu1 %vm1196_vm2, %v3340_v63  ;;  %1502 = vmatprep.subr.mxu1 %v3919_v50  ;;  %v1596_v63 = vld [vmem:[%s5604_s5 + $0x58] sm:$0xff] }
 0x14f   : > { %1366 = vmatprep.mubr.f32.mxu1 %v3919_v50  ;;  %1503 = vmatpush1.msra.mxu1 %v3363_v0  ;;  %v1595_v0 = vld [vmem:[%s5604_s5 + $0x50] sm:$0xff] }
 0x150   : > { %1504 = vmatprep.subr.mxu1 %v3919_v50 }
 0x151   : > { %1505 = vmatpush1.msra.mxu1 %v3362_v1  ;;  %v3384_v1 = vld [vmem:[%s5604_s5 + $0x118] sm:$0xff] }
 0x152   : > { %3345 = vmatmul.mubr.msk.f32.gmra.mxu1 %vm1196_vm2, %v3341_v2  ;;  %1506 = vmatprep.subr.mxu1 %v3919_v50  ;;  %v1594_v2 = vld [vmem:[%s5604_s5 + $0x48] sm:$0xff] }
 0x153   : > { %1507 = vmatpush1.msra.mxu1 %v3361_v4  ;;  %v3383_v4 = vld [vmem:[%s5604_s5 + $0x110] sm:$0xff] }
 0x154   : > { %1508 = vmatprep.subr.mxu1 %v3919_v50 }
 0x155   : > { %1509 = vmatpush1.msra.mxu1 %v3360_v5  ;;  %v1593_v5 = vld [vmem:[%s5604_s5 + $0x40] sm:$0xff] }
 0x156   : > { %1510 = vmatprep.subr.mxu1 %v3919_v50 }
 0x157   : > { %1511 = vmatpush1.msra.mxu1 %v3359_v6  ;;  %v3382_v6 = vld [vmem:[%s5604_s5 + $0x108] sm:$0xff] }
 0x158   : > { %1512 = vmatprep.subr.mxu1 %v3919_v50 }
 0x159   : > { %1513 = vmatpush1.msra.mxu1 %v3358_v7  ;;  %v1592_v7 = vld [vmem:[%s5604_s5 + $0x38] sm:$0xff] }
 0x15a   : > { %1514 = vmatprep.subr.mxu1 %v3919_v50 }
 0x15b   : > { %1515 = vmatpush1.msra.mxu1 %v3357_v8  ;;  %v3381_v8 = vld [vmem:[%s5604_s5 + $0x100] sm:$0xff] }
 0x15c   : > { %1516 = vmatprep.subr.mxu1 %v3919_v50 }
 0x15d   : > { %1517 = vmatpush1.msra.mxu1 %v3356_v9  ;;  %v1591_v9 = vld [vmem:[%s5604_s5 + $0x30] sm:$0xff] }
 0x15e   : > { %1518 = vmatprep.subr.mxu1 %v3919_v50 }
 0x15f   : > { %1519 = vmatpush1.msra.mxu1 %v3355_v10  ;;  %v3380_v10 = vld [vmem:[%s5604_s5 + $0xf8] sm:$0xff] }
 0x160   : > { %1520 = vmatprep.subr.mxu1 %v3919_v50 }
 0x161   : > { %1521 = vmatpush1.msra.mxu1 %v3354_v11  ;;  %v1590_v11 = vld [vmem:[%s5604_s5 + $0x28] sm:$0xff] }
 0x162   : > { %1522 = vmatprep.subr.mxu1 %v3919_v50 }
 0x163   : > { %1523 = vmatpush1.msra.mxu1 %v3353_v12  ;;  %v3379_v12 = vld [vmem:[%s5604_s5 + $0xf0] sm:$0xff] }
 0x164   : > { %1524 = vmatprep.subr.mxu1 %v3919_v50 }
 0x165   : > { %1525 = vmatpush1.msra.mxu1 %v3352_v13  ;;  %v1589_v13 = vld [vmem:[%s5604_s5 + $0x20] sm:$0xff] }
 0x166   : > { %1526 = vmatprep.subr.mxu1 %v3919_v50 }
 0x167   : > { %1527 = vmatpush1.msra.mxu1 %v3351_v14  ;;  %v3378_v14 = vld [vmem:[%s5604_s5 + $0xe8] sm:$0xff] }
 0x168   : > { %1528 = vmatprep.subr.mxu1 %v3919_v50 }
 0x169   : > { %1529 = vmatpush1.msra.mxu1 %v3350_v15  ;;  %v1588_v15 = vld [vmem:[%s5604_s5 + $0x18] sm:$0xff] }
 0x16a   : > { %1530 = vmatprep.subr.mxu1 %v3919_v50 }
 0x16b   : > { %1531 = vmatpush1.msra.mxu1 %v3349_v17  ;;  %v1587_v17 = vld [vmem:[%s5604_s5 + $0x10] sm:$0xff] }
 0x16c   : > { %1532 = vmatprep.subr.mxu1 %v3919_v50 }
 0x16d   : > { %1533 = vmatpush1.msra.mxu1 %v3348_v20  ;;  %v1586_v20 = vld [vmem:[%s5604_s5 + $0x8] sm:$0xff] }
 0x16e   : > { %1556 = vmatprep.subr.mxu1 %v3919_v50 }
 0x16f   : > { %1557 = vmatpush2.msra.mxu1 %v3368_v22  ;;  %v1585_v22 = vld [vmem:[%s5604_s5] sm:$0xff] }
 0x170   : > { %1558 = vmatprep.subr.mxu1 %v3919_v50 }
 0x171   : > { %1559 = vmatpush2.msra.mxu1 %v3367_v25  ;;  %v3448_v25 = vld [vmem:[%s5604_s5 + $0x2b8] sm:$0xf] }
 0x172   : > { %1560 = vmatprep.subr.mxu1 %v3919_v50 }
 0x173   : > { %1561 = vmatpush2.msra.mxu1 %v3366_v27  ;;  %v3372_v27 = vld [vmem:[%s5604_s5 + $0xb8] sm:$0xff] }
 0x174   : > { %1562 = vmatprep.subr.mxu1 %v3919_v50 }
 0x175   : > { %1563 = vmatpush2.msra.mxu1 %v3365_v31  ;;  %v3422_v31 = vld [vmem:[%s5604_s5 + $0x208] sm:$0xf] }
 0x176   : > { %1564 = vmatprep.subr.mxu1 %v3919_v50 }
 0x177   : > { %1565 = vmatpush2.msra.mxu1 %v3364_v29 }
 0x178   : > { %3397 = vmatprep.subr.msk.mxu1 %vm1203_vm1, %v1606_v32 }
 0x206   : > { %v1276_v34 = vpop.f32.mrf.mxu1 }
 0x208   : > { %v1278_v35 = vpop.f32.mrf.mxu1 }
 0x20a   : > { %v1282_v36 = vpop.f32.mrf.mxu1 }
 0x20c   : > { %v1284_v37 = vpop.f32.mrf.mxu1 }
 0x20e   : > { %v1362_v38 = vpop.f32.mrf.mxu1 }
 0x20f   : > { %v1373_v41 = vmax.f32 %v1276_v34, %v1362_v38 }
 0x210   : > { %v1364_v39 = vpop.f32.mrf.mxu1 }
 0x211   : > { %v1374_v40 = vmax.f32 %v1278_v35, %v1364_v39 }
 0x212   : > { %v1368_v42 = vpop.f32.mrf.mxu1 }
 0x213   : > { %3346 = vmatprep.mubr.msk.f32.mxu0 %vm1398_vm3, %v1374_v40  ;;  %3369 = vmatprep.mubr.msk.f32.mxu1 %vm1398_vm3, %v1374_v40  ;;  %v1375_v52 = vmax.f32 %v1282_v36, %v1368_v42  ;;  %v3447_v40 = vld [vmem:[%s5604_s5 + $0x2b0] sm:$0xf]  ;;  %v3446_v42 = vld [vmem:[%s5604_s5 + $0x2a8] sm:$0xff] }
 0x214   : > { %v1370_v48 = vpop.f32.mrf.mxu1  ;;  %1470 = vmatmul.mubr.f32.vlgmr.msra.gmra.mxu0 %v1373_v41  ;;  %1567 = vmatmul.mubr.f32.vlgmr.msra.gmra.mxu1 %v1373_v41 }
 0x215   : > { %v1376_v51 = vmax.f32 %v1284_v37, %v1370_v48  ;;  %3398 = vmatpush1.msk.msra.mxu1 %vm1203_vm1, %v1605_v43  ;;  %3394 = vmatpush1.msk.msra.mxu0 %vm1203_vm1, %v3391_v44  ;;  %v3445_v43 = vld [vmem:[%s5604_s5 + $0x2a0] sm:$0xff]  ;;  %v3444_v44 = vld [vmem:[%s5604_s5 + $0x298] sm:$0xff] }
 0x216   : > { %1745 = vmatprep.subr.mxu1 %v1604_v45  ;;  %1656 = vmatprep.subr.mxu0 %v3390_v46  ;;  %v3421_v45 = vld [vmem:[%s5604_s5 + $0x200] sm:$0xf]  ;;  %v3443_v46 = vld [vmem:[%s5604_s5 + $0x290] sm:$0xff] }
 0x217   : > { %3347 = vmatprep.mubr.msk.f32.mxu0 %vm1398_vm3, %v1376_v51  ;;  %3370 = vmatprep.mubr.msk.f32.mxu1 %vm1398_vm3, %v1376_v51 }
 0x218   : > { %1475 = vmatmul.mubr.f32.gmra.mxu0 %v1375_v52  ;;  %1572 = vmatmul.mubr.f32.gmra.mxu1 %v1375_v52  ;;  %v3420_v52 = vld [vmem:[%s5604_s5 + $0x1f8] sm:$0xff] }
 0x219   : > { %1746 = vmatpush1.msra.mxu1 %v1603_v53  ;;  %1657 = vmatpush1.msra.mxu0 %v3389_v54  ;;  %v3442_v53 = vld [vmem:[%s5604_s5 + $0x288] sm:$0xff]  ;;  %v3419_v54 = vld [vmem:[%s5604_s5 + $0x1f0] sm:$0xff] }
 0x21a   : > { %1747 = vmatprep.subr.mxu1 %v1602_v55  ;;  %1658 = vmatprep.subr.mxu0 %v3388_v49  ;;  %v3441_v55 = vld [vmem:[%s5604_s5 + $0x280] sm:$0xff]  ;;  %v3418_v49 = vld [vmem:[%s5604_s5 + $0x1e8] sm:$0xff] }
 0x21b   : > { %1748 = vmatpush1.msra.mxu1 %v1601_v56  ;;  %1659 = vmatpush1.msra.mxu0 %v3387_v57  ;;  %v3440_v56 = vld [vmem:[%s5604_s5 + $0x278] sm:$0xff]  ;;  %v3439_v57 = vld [vmem:[%s5604_s5 + $0x270] sm:$0xff] }
 0x21c   : > { %1749 = vmatprep.subr.mxu1 %v1600_v47  ;;  %1660 = vmatprep.subr.mxu0 %v3386_v59  ;;  %v3417_v47 = vld [vmem:[%s5604_s5 + $0x1e0] sm:$0xff]  ;;  %v3438_v59 = vld [vmem:[%s5604_s5 + $0x268] sm:$0xff] }
 0x21d   : > { %1750 = vmatpush1.msra.mxu1 %v1599_v60  ;;  %1661 = vmatpush1.msra.mxu0 %v3385_v58  ;;  %v3416_v58 = vld [vmem:[%s5604_s5 + $0x1d8] sm:$0xff] }
 0x21e   : > { %1751 = vmatprep.subr.mxu1 %v1598_v61  ;;  %1797 = vmatprep.mubr.f32.mxu1 %v3919_v50  ;;  %v3437_v61 = vld [vmem:[%s5604_s5 + $0x260] sm:$0xff] }
 0x21f   : > { %1752 = vmatpush1.msra.mxu1 %v1597_v62  ;;  %1708 = vmatprep.mubr.f32.mxu0 %v3919_v50  ;;  %v3415_v62 = vld [vmem:[%s5604_s5 + $0x1d0] sm:$0xff] }
 0x220   : > { %1753 = vmatprep.subr.mxu1 %v1596_v63  ;;  %1662 = vmatprep.subr.mxu0 %v3384_v1  ;;  %v3436_v63 = vld [vmem:[%s5604_s5 + $0x258] sm:$0xff]  ;;  %v3435_v1 = vld [vmem:[%s5604_s5 + $0x250] sm:$0xff] }
 0x221   : > { %1754 = vmatpush1.msra.mxu1 %v1595_v0  ;;  %1663 = vmatpush1.msra.mxu0 %v3383_v4  ;;  %v3414_v0 = vld [vmem:[%s5604_s5 + $0x1c8] sm:$0xff] }
 0x222   : > { %1755 = vmatprep.subr.mxu1 %v1594_v2  ;;  %1664 = vmatprep.subr.mxu0 %v3382_v6  ;;  %v3413_v2 = vld [vmem:[%s5604_s5 + $0x1c0] sm:$0xff]  ;;  %v3434_v4 = vld [vmem:[%s5604_s5 + $0x248] sm:$0xff] }
 0x223   : > { %1756 = vmatpush1.msra.mxu1 %v1593_v5  ;;  %1665 = vmatpush1.msra.mxu0 %v3381_v8  ;;  %v3412_v5 = vld [vmem:[%s5604_s5 + $0x1b8] sm:$0xff]  ;;  %v3433_v6 = vld [vmem:[%s5604_s5 + $0x240] sm:$0xff] }
 0x224   : > { %1757 = vmatprep.subr.mxu1 %v1592_v7  ;;  %1666 = vmatprep.subr.mxu0 %v3380_v10  ;;  %v3411_v7 = vld [vmem:[%s5604_s5 + $0x1b0] sm:$0xff]  ;;  %v3432_v8 = vld [vmem:[%s5604_s5 + $0x238] sm:$0xff] }
 0x225   : > { %1758 = vmatpush1.msra.mxu1 %v1591_v9  ;;  %1667 = vmatpush1.msra.mxu0 %v3379_v12  ;;  %v3410_v9 = vld [vmem:[%s5604_s5 + $0x1a8] sm:$0xff]  ;;  %v3431_v10 = vld [vmem:[%s5604_s5 + $0x230] sm:$0xff] }
 0x226   : > { %1759 = vmatprep.subr.mxu1 %v1590_v11  ;;  %1668 = vmatprep.subr.mxu0 %v3378_v14  ;;  %v3409_v11 = vld [vmem:[%s5604_s5 + $0x1a0] sm:$0xff]  ;;  %v3430_v12 = vld [vmem:[%s5604_s5 + $0x228] sm:$0xff] }
 0x227   : > { %1760 = vmatpush1.msra.mxu1 %v1589_v13  ;;  %1669 = vmatpush1.msra.mxu0 %v3377_v16  ;;  %v3408_v13 = vld [vmem:[%s5604_s5 + $0x198] sm:$0xff]  ;;  %v3429_v14 = vld [vmem:[%s5604_s5 + $0x220] sm:$0xff] }
 0x228   : > { %1761 = vmatprep.subr.mxu1 %v1588_v15  ;;  %1670 = vmatprep.subr.mxu0 %v3376_v19  ;;  %v3407_v15 = vld [vmem:[%s5604_s5 + $0x190] sm:$0xff]  ;;  %v3428_v16 = vld [vmem:[%s5604_s5 + $0x218] sm:$0xff] }
 0x229   : > { %1762 = vmatpush1.msra.mxu1 %v1587_v17  ;;  %1671 = vmatpush1.msra.mxu0 %v3375_v21  ;;  %v3406_v17 = vld [vmem:[%s5604_s5 + $0x188] sm:$0xff]  ;;  %v3427_v19 = vld [vmem:[%s5604_s5 + $0x210] sm:$0xff]  ;;  %v3404_v21 = vld [vmem:[%s5604_s5 + $0x178] sm:$0xff] }
 0x22a   : > { %1763 = vmatprep.subr.mxu1 %v1586_v20  ;;  %1672 = vmatprep.subr.mxu0 %v3374_v23  ;;  %v3405_v20 = vld [vmem:[%s5604_s5 + $0x180] sm:$0xff] }
 0x22b   : > { %1764 = vmatpush1.msra.mxu1 %v1585_v22  ;;  %1673 = vmatpush1.msra.mxu0 %v3373_v26  ;;  %v3403_v22 = vld [vmem:[%s5604_s5 + $0x170] sm:$0xff]  ;;  %v3401_v26 = vld [vmem:[%s5604_s5 + $0x160] sm:$0xff] }
 0x22c   : > { %3449 = vmatprep.subr.msk.mxu1 %vm1203_vm1, %v3448_v25  ;;  %1674 = vmatprep.subr.mxu0 %v3372_v27  ;;  %v3402_v25 = vld [vmem:[%s5604_s5 + $0x168] sm:$0xff] }
 0x22d   : > { %1675 = vmatpush1.msra.mxu0 %v3371_v30  ;;  %v3474_v27 = vld [vmem:[%s5604_s5 + $0x368] sm:$0xf] }
 0x22e   : > { %3423 = vmatprep.subr.msk.mxu0 %vm1203_vm1, %v3422_v31 }
 0x2d4   : > { %v1471_v28 = vpop.f32.mrf.mxu0  ;;  %v1568_v29 = vpop.f32.mrf.mxu1 }
 0x2d5   : > { %v1577_v32 = vmax.f32 %v1471_v28, %v1568_v29  ;;  %v3473_v28 = vld [vmem:[%s5604_s5 + $0x360] sm:$0xf]  ;;  %v3472_v29 = vld [vmem:[%s5604_s5 + $0x358] sm:$0xff] }
 0x2d6   : > { %v1473_v33 = vpop.f32.mrf.mxu0  ;;  %v1570_v34 = vpop.f32.mrf.mxu1 }
 0x2d7   : > { %1580 = vst.msk [vmem:[#allocation2] sm:$0xff] %vm1579_vm4, %v1577_v32  ;;  %v3471_v32 = vld [vmem:[%s5604_s5 + $0x350] sm:$0xff]  ;;  %v3470_v33 = vld [vmem:[%s5604_s5 + $0x348] sm:$0xff]  ;;  %v3469_v34 = vld [vmem:[%s5604_s5 + $0x340] sm:$0xff] }
 0x2d8   : > { %v1476_v35 = vpop.f32.mrf.mxu0  ;;  %v1573_v36 = vpop.f32.mrf.mxu1 }
 0x2d9   : > { %v1578_v37 = vmax.f32 %v1476_v35, %v1573_v36  ;;  %v3468_v36 = vld [vmem:[%s5604_s5 + $0x338] sm:$0xff] }
 0x2da   : > { %v1478_v38 = vpop.f32.mrf.mxu0  ;;  %v1575_v39 = vpop.f32.mrf.mxu1 }
 0x2db   : > { %1582 = vst.msk [vmem:[#allocation2 + $0x8] sm:$0x3f] %vm1581_vm5, %v1578_v37  ;;  %v3467_v37 = vld [vmem:[%s5604_s5 + $0x330] sm:$0xff]  ;;  %v3466_v38 = vld [vmem:[%s5604_s5 + $0x328] sm:$0xff]  ;;  %v3465_v39 = vld [vmem:[%s5604_s5 + $0x320] sm:$0xff] }
 0x2de   : > { %v1583_v41 = vld [vmem:[#allocation2] sm:$0xff] }
 0x2df   : > { %3399 = vmatmul.mubr.msk.f32.vlgmr.msra.gmra.mxu1 %vm1579_vm4, %v1583_v41  ;;  %v3463_v41 = vld [vmem:[%s5604_s5 + $0x310] sm:$0xff] }
 0x2e0   : > { %3450 = vmatpush1.msk.msra.mxu1 %vm1203_vm1, %v3447_v40  ;;  %1803 = vmatprep.mubr.f32.mxu1 %v3919_v50  ;;  %v3464_v40 = vld [vmem:[%s5604_s5 + $0x318] sm:$0xff] }
 0x2e1   : > { %1977 = vmatprep.subr.mxu1 %v3446_v42  ;;  %v3462_v42 = vld [vmem:[%s5604_s5 + $0x308] sm:$0xff] }
 0x2e2   : > { %1978 = vmatpush1.msra.mxu1 %v3445_v43  ;;  %v1607_v48 = vld [vmem:[#allocation2 + $0x1] sm:$0xff]  ;;  %v1608_v60 = vld [vmem:[#allocation2 + $0x9] sm:$0x3]  ;;  %v1929_v31 = vld [vmem:[#allocation2 + $0xb] sm:$0x3] }
 0x2e3   : > { %v1584_v51 = vld [vmem:[#allocation2 + $0x8] sm:$0x3]  ;;  %1979 = vmatprep.subr.mxu1 %v3444_v44  ;;  %3395 = vmatmul.mubr.msk.f32.vlgmr.msra.gmra.mxu0 %vm1579_vm4, %v1607_v48  ;;  %v1811_v35 = vld [vmem:[#allocation2 + $0xa] sm:$0x3]  ;;  %v3461_v43 = vld [vmem:[%s5604_s5 + $0x300] sm:$0xff] }
 0x2e4   : > { %3400 = vmatmul.mubr.msk.f32.gmra.mxu1 %vm1579_vm4, %v1584_v51  ;;  %3424 = vmatpush1.msk.msra.mxu0 %vm1203_vm1, %v3421_v45  ;;  %v1928_v23 = vld [vmem:[#allocation2 + $0x3] sm:$0xff]  ;;  %v3460_v44 = vld [vmem:[%s5604_s5 + $0x2f8] sm:$0xff]  ;;  %v3459_v45 = vld [vmem:[%s5604_s5 + $0x2f0] sm:$0xff] }
 0x2e5   : > { %1980 = vmatpush1.msra.mxu1 %v3443_v46  ;;  %1859 = vmatprep.subr.mxu0 %v3420_v52  ;;  %v1810_v30 = vld [vmem:[#allocation2 + $0x2] sm:$0xff]  ;;  %v3456_v51 = vld [vmem:[%s5604_s5 + $0x2d8] sm:$0xff]  ;;  %v3455_v52 = vld [vmem:[%s5604_s5 + $0x2d0] sm:$0xff] }
 0x2e6   : > { %1981 = vmatprep.subr.mxu1 %v3442_v53  ;;  %1860 = vmatpush1.msra.mxu0 %v3419_v54  ;;  %v3458_v46 = vld [vmem:[%s5604_s5 + $0x2e8] sm:$0xff]  ;;  %v3457_v48 = vld [vmem:[%s5604_s5 + $0x2e0] sm:$0xff] }
 0x2e7   : > { %1982 = vmatpush1.msra.mxu1 %v3441_v55  ;;  %1714 = vmatprep.mubr.f32.mxu0 %v3919_v50  ;;  %v3454_v53 = vld [vmem:[%s5604_s5 + $0x2c8] sm:$0xff]  ;;  %v3453_v54 = vld [vmem:[%s5604_s5 + $0x2c0] sm:$0xff] }
 0x2e8   : > { %1861 = vmatprep.subr.mxu0 %v3418_v49  ;;  %1983 = vmatprep.subr.mxu1 %v3440_v56  ;;  %v2046_v55 = vld [vmem:[#allocation2 + $0x4] sm:$0xff]  ;;  %v2047_v49 = vld [vmem:[#allocation2 + $0xc] sm:$0x3]  ;;  %v3502_v56 = vld [vmem:[%s5607_s8 + $0x118] sm:$0xff] }
 0x2e9   : > { %3396 = vmatmul.mubr.msk.f32.gmra.mxu0 %vm1579_vm4, %v1608_v60  ;;  %1984 = vmatpush1.msra.mxu1 %v3439_v57  ;;  %v3501_v57 = vld [vmem:[%s5607_s8 + $0x110] sm:$0xff]  ;;  %v3498_v60 = vld [vmem:[%s5607_s8 + $0xf8] sm:$0xff] }
 0x2ea   : > { %1862 = vmatpush1.msra.mxu0 %v3417_v47  ;;  %1985 = vmatprep.subr.mxu1 %v3438_v59  ;;  %v3500_v47 = vld [vmem:[%s5607_s8 + $0x108] sm:$0xff]  ;;  %v3499_v59 = vld [vmem:[%s5607_s8 + $0x100] sm:$0xff] }
 0x2eb   : > { %1863 = vmatprep.subr.mxu0 %v3416_v58  ;;  %1986 = vmatpush1.msra.mxu1 %v3437_v61  ;;  %v3497_v58 = vld [vmem:[%s5607_s8 + $0xf0] sm:$0xff]  ;;  %v3496_v61 = vld [vmem:[%s5607_s8 + $0xe8] sm:$0xff] }
 0x2ec   : > { %1864 = vmatpush1.msra.mxu0 %v3415_v62  ;;  %1987 = vmatprep.subr.mxu1 %v3436_v63  ;;  %v3495_v62 = vld [vmem:[%s5607_s8 + $0xe0] sm:$0xff]  ;;  %v3494_v63 = vld [vmem:[%s5607_s8 + $0xd8] sm:$0xff] }
 0x2ed   : > { %1865 = vmatprep.subr.mxu0 %v3414_v0  ;;  %1988 = vmatpush1.msra.mxu1 %v3435_v1  ;;  %v3493_v0 = vld [vmem:[%s5607_s8 + $0xd0] sm:$0xff]  ;;  %v3492_v1 = vld [vmem:[%s5607_s8 + $0xc8] sm:$0xff] }
 0x2ee   : > { %1866 = vmatpush1.msra.mxu0 %v3413_v2  ;;  %1989 = vmatprep.subr.mxu1 %v3434_v4  ;;  %v3491_v2 = vld [vmem:[%s5607_s8 + $0xc0] sm:$0xff]  ;;  %v3490_v4 = vld [vmem:[%s5607_s8 + $0xb8] sm:$0xff] }
 0x2ef   : > { %1867 = vmatprep.subr.mxu0 %v3412_v5  ;;  %1990 = vmatpush1.msra.mxu1 %v3433_v6  ;;  %v3489_v5 = vld [vmem:[%s5607_s8 + $0xb0] sm:$0xff]  ;;  %v3488_v6 = vld [vmem:[%s5607_s8 + $0xa8] sm:$0xff] }
 0x2f0   : > { %1868 = vmatpush1.msra.mxu0 %v3411_v7  ;;  %1991 = vmatprep.subr.mxu1 %v3432_v8 }
 0x2f1   : > { %1869 = vmatprep.subr.mxu0 %v3410_v9  ;;  %1992 = vmatpush1.msra.mxu1 %v3431_v10 }
 0x2f2   : > { %1870 = vmatpush1.msra.mxu0 %v3409_v11  ;;  %1993 = vmatprep.subr.mxu1 %v3430_v12 }
 0x2f3   : > { %1871 = vmatprep.subr.mxu0 %v3408_v13  ;;  %1994 = vmatpush1.msra.mxu1 %v3429_v14 }
 0x2f4   : > { %1872 = vmatpush1.msra.mxu0 %v3407_v15  ;;  %1995 = vmatprep.subr.mxu1 %v3428_v16 }
 0x2f5   : > { %1873 = vmatprep.subr.mxu0 %v3406_v17  ;;  %1996 = vmatpush1.msra.mxu1 %v3427_v19 }
 0x2f6   : > { %1874 = vmatpush1.msra.mxu0 %v3405_v20  ;;  %2029 = vmatprep.mubr.f32.mxu1 %v3919_v50 }
 0x2f7   : > { %1875 = vmatprep.subr.mxu0 %v3404_v21  ;;  %3451 = vmatmul.mubr.msk.f32.vlgmr.msra.gmra.mxu1 %vm1579_vm4, %v1928_v23 }
 0x2f8   : > { %1876 = vmatpush1.msra.mxu0 %v3403_v22  ;;  %1911 = vmatprep.mubr.f32.mxu0 %v3919_v50 }
 0x2f9   : > { %1877 = vmatprep.subr.mxu0 %v3402_v25  ;;  %2035 = vmatprep.mubr.f32.mxu1 %v3919_v50 }
 0x2fa   : > { %1878 = vmatpush1.msra.mxu0 %v3401_v26 }
 0x2fb   : > { %3425 = vmatmul.mubr.msk.f32.vlgmr.msra.gmra.mxu0 %vm1579_vm4, %v1810_v30  ;;  %3452 = vmatmul.mubr.msk.f32.gmra.mxu1 %vm1579_vm4, %v1929_v31 }
 0x2fc   : > { %3475 = vmatprep.subr.msk.mxu0 %vm1203_vm1, %v3474_v27  ;;  %1917 = vmatprep.mubr.f32.mxu0 %v3919_v50 }
 0x2fd   : > { %3476 = vmatpush1.msk.msra.mxu0 %vm1203_vm1, %v3473_v28  ;;  %2260 = vmatprep.mubr.f32.mxu1 %v3919_v50 }
 0x2fe   : > { %2095 = vmatprep.subr.mxu0 %v3472_v29 }
 0x2ff   : > { %2096 = vmatpush1.msra.mxu0 %v3471_v32 }
 0x300   : > { %3426 = vmatmul.mubr.msk.f32.gmra.mxu0 %vm1579_vm4, %v1811_v35  ;;  %2097 = vmatprep.subr.mxu0 %v3470_v33 }
 0x301   : > { %2098 = vmatpush1.msra.mxu0 %v3469_v34  ;;  %2147 = vmatprep.mubr.f32.mxu0 %v3919_v50  ;;  %v2164_v34 = vld [vmem:[%s5605_s6] sm:$0x3] }
 0x302   : > { %2099 = vmatprep.subr.mxu0 %v3468_v36 }
 0x303   : > { %2100 = vmatpush1.msra.mxu0 %v3467_v37 }
 0x304   : > { %2101 = vmatprep.subr.mxu0 %v3466_v38 }
 0x305   : > { %2102 = vmatpush1.msra.mxu0 %v3465_v39 }
 0x306   : > { %2103 = vmatprep.subr.mxu0 %v3464_v40 }
 0x307   : > { %2104 = vmatpush1.msra.mxu0 %v3463_v41  ;;  %v2173_v41 = vrot.slane %v2164_v34, %v1174_v24  ;;  %v2184_v24 = vld [vmem:[%s5606_s7] sm:$0x1f] }
 0x308   : > { %2105 = vmatprep.subr.mxu0 %v3462_v42 }
 0x309   : > { %2106 = vmatpush1.msra.mxu0 %v3461_v43 }
 0x30a   : > { %2107 = vmatprep.subr.mxu0 %v3460_v44 }
 0x30b   : > { %2108 = vmatpush1.msra.mxu0 %v3459_v45  ;;  %v2169_v45 = vrot.slane %v2164_v34, %v1170_v18  ;;  %v2360_v18 = vld [vmem:[%s5607_s8 + $0x78] sm:$0xff]  ;;  %v2540_v34 = vld [vmem:[%s5608_s9 + $0x28] sm:$0xff] }
 0x30c   : > { %2109 = vmatprep.subr.mxu0 %v3458_v46 }
 0x30d   : > { %2110 = vmatpush1.msra.mxu0 %v3457_v48 }
 0x30e   : > { %2111 = vmatprep.subr.mxu0 %v3456_v51 }
 0x30f   : > { %2112 = vmatpush1.msra.mxu0 %v3455_v52 }
 0x310   : > { %2113 = vmatprep.subr.mxu0 %v3454_v53 }
 0x311   : > { %2114 = vmatpush1.msra.mxu0 %v3453_v54 }
 0x312   : > { %3477 = vmatmul.mubr.msk.f32.vlgmr.msra.gmra.mxu0 %vm1579_vm4, %v2046_v55  ;;  %2460 = vmatprep.subr.mxu0 %v3919_v50 }
 0x313   : > { %2153 = vmatprep.mubr.f32.mxu0 %v3919_v50  ;;  %2461 = vmatpush1.msra.mxu0 %v3502_v56 }
 0x314   : > { %2462 = vmatprep.subr.mxu0 %v3919_v50 }
 0x315   : > { %2463 = vmatpush1.msra.mxu0 %v3501_v57 }
 0x316   : > { %3478 = vmatmul.mubr.msk.f32.gmra.mxu0 %vm1579_vm4, %v2047_v49  ;;  %2464 = vmatprep.subr.mxu0 %v3919_v50 }
 0x317   : > { %2465 = vmatpush1.msra.mxu0 %v3500_v47  ;;  %v2359_v47 = vld [vmem:[%s5607_s8 + $0x70] sm:$0xff] }
 0x318   : > { %2466 = vmatprep.subr.mxu0 %v3919_v50 }
 0x319   : > { %2467 = vmatpush1.msra.mxu0 %v3499_v59  ;;  %v2358_v59 = vld [vmem:[%s5607_s8 + $0x68] sm:$0xff] }
 0x31a   : > { %2468 = vmatprep.subr.mxu0 %v3919_v50 }
 0x31b   : > { %2469 = vmatpush1.msra.mxu0 %v3498_v60  ;;  %v2357_v60 = vld [vmem:[%s5607_s8 + $0x60] sm:$0xff] }
 0x31c   : > { %2470 = vmatprep.subr.mxu0 %v3919_v50 }
 0x31d   : > { %2471 = vmatpush1.msra.mxu0 %v3497_v58  ;;  %v2356_v58 = vld [vmem:[%s5607_s8 + $0x58] sm:$0xff] }
 0x31e   : > { %2472 = vmatprep.subr.mxu0 %v3919_v50 }
 0x31f   : > { %2473 = vmatpush1.msra.mxu0 %v3496_v61  ;;  %v2355_v61 = vld [vmem:[%s5607_s8 + $0x50] sm:$0xff] }
 0x320   : > { %2474 = vmatprep.subr.mxu0 %v3919_v50 }
 0x321   : > { %2475 = vmatpush1.msra.mxu0 %v3495_v62  ;;  %v2354_v62 = vld [vmem:[%s5607_s8 + $0x48] sm:$0xff] }
 0x322   : > { %2476 = vmatprep.subr.mxu0 %v3919_v50 }
 0x323   : > { %2477 = vmatpush1.msra.mxu0 %v3494_v63  ;;  %v2353_v63 = vld [vmem:[%s5607_s8 + $0x40] sm:$0xff] }
 0x324   : > { %2478 = vmatprep.subr.mxu0 %v3919_v50 }
 0x325   : > { %2479 = vmatpush1.msra.mxu0 %v3493_v0  ;;  %v2352_v0 = vld [vmem:[%s5607_s8 + $0x38] sm:$0xff] }
 0x326   : > { %2480 = vmatprep.subr.mxu0 %v3919_v50 }
 0x327   : > { %2481 = vmatpush1.msra.mxu0 %v3492_v1  ;;  %v2351_v1 = vld [vmem:[%s5607_s8 + $0x30] sm:$0xff] }
 0x328   : > { %2482 = vmatprep.subr.mxu0 %v3919_v50 }
 0x329   : > { %2483 = vmatpush1.msra.mxu0 %v3491_v2  ;;  %v2350_v2 = vld [vmem:[%s5607_s8 + $0x28] sm:$0xff] }
 0x32a   : > { %2484 = vmatprep.subr.mxu0 %v3919_v50 }
 0x32b   : > { %2485 = vmatpush1.msra.mxu0 %v3490_v4  ;;  %v2349_v4 = vld [vmem:[%s5607_s8 + $0x20] sm:$0xff] }
 0x32c   : > { %2486 = vmatprep.subr.mxu0 %v3919_v50 }
 0x32d   : > { %2487 = vmatpush1.msra.mxu0 %v3489_v5  ;;  %v2348_v5 = vld [vmem:[%s5607_s8 + $0x18] sm:$0xff] }
 0x32e   : > { %2488 = vmatprep.subr.mxu0 %v3919_v50 }
 0x32f   : > { %2489 = vmatpush1.msra.mxu0 %v3488_v6  ;;  %v2347_v6 = vld [vmem:[%s5607_s8 + $0x10] sm:$0xff] }
 0x330   : > { %2490 = vmatprep.subr.mxu0 %v3919_v50 }
 0x39f   : > { %v1799_v9 = vpop.f32.mrf.mxu1 }
 0x3a1   : > { %v1801_v11 = vpop.f32.mrf.mxu1 }
 0x3a3   : > { %v1710_v7 = vpop.f32.mrf.mxu0 }
 0x3a4   : > { %v1805_v13 = vpop.f32.mrf.mxu1  ;;  %v1800_v23 = vadd.f32 %v1799_v9, %v1710_v7  ;;  %v2346_v7 = vld [vmem:[%s5607_s8 + $0x8] sm:$0xff]  ;;  %v3487_v9 = vld [vmem:[%s5607_s8 + $0xa0] sm:$0xff] }
 0x3a5   : > { %v1712_v8 = vpop.f32.mrf.mxu0  ;;  %2491 = vmatpush1.msra.mxu0 %v3487_v9 }
 0x3a6   : > { %v1807_v15 = vpop.f32.mrf.mxu1  ;;  %v1802_v21 = vadd.f32 %v1801_v11, %v1712_v8  ;;  %v2345_v8 = vld [vmem:[%s5607_s8] sm:$0xff]  ;;  %2516 = vmatprep.subr.mxu0 %v3919_v50  ;;  %v3506_v11 = vld [vmem:[%s5607_s8 + $0x138] sm:$0xff] }
 0x3a7   : > { %2517 = vmatpush2.msra.mxu0 %v3506_v11  ;;  %v3550_v11 = vld [vmem:[%s5608_s9 + $0x180] sm:$0xff] }
 0x3a8   : > { %2518 = vmatprep.subr.mxu0 %v3919_v50 }
 0x3a9   : > { %v1716_v10 = vpop.f32.mrf.mxu0 }
 0x3aa   : > { %v1806_v22 = vadd.f32 %v1805_v13, %v1716_v10  ;;  %v2364_v10 = vld [vmem:[%s5607_s8 + $0x98] sm:$0xff]  ;;  %v3505_v13 = vld [vmem:[%s5607_s8 + $0x130] sm:$0xff] }
 0x3ab   : > { %v1718_v12 = vpop.f32.mrf.mxu0  ;;  %2519 = vmatpush2.msra.mxu0 %v3505_v13  ;;  %v3548_v13 = vld [vmem:[%s5608_s9 + $0x170] sm:$0xff] }
 0x3ac   : > { %v1808_v26 = vadd.f32 %v1807_v15, %v1718_v12  ;;  %v2363_v12 = vld [vmem:[%s5607_s8 + $0x90] sm:$0xff]  ;;  %2520 = vmatprep.subr.mxu0 %v3919_v50  ;;  %v3504_v15 = vld [vmem:[%s5607_s8 + $0x128] sm:$0xff] }
 0x3ad   : > { %2521 = vmatpush2.msra.mxu0 %v3504_v15  ;;  %v3546_v15 = vld [vmem:[%s5608_s9 + $0x160] sm:$0xff] }
 0x3ae   : > { %2522 = vmatprep.subr.mxu0 %v3919_v50 }
 0x3b7   : > { %v2031_v17 = vpop.f32.mrf.mxu1 }
 0x3b9   : > { %v2033_v20 = vpop.f32.mrf.mxu1 }
 0x3bb   : > { %v1913_v14 = vpop.f32.mrf.mxu0  ;;  %v2037_v28 = vpop.f32.mrf.mxu1 }
 0x3bc   : > { %v1924_v31 = vadd.f32 %v1913_v14, %v1800_v23  ;;  %v2362_v14 = vld [vmem:[%s5607_s8 + $0x88] sm:$0xff] }
 0x3bd   : > { %v1915_v16 = vpop.f32.mrf.mxu0  ;;  %v2039_v37 = vpop.f32.mrf.mxu1 }
 0x3be   : > { %v1925_v27 = vadd.f32 %v1915_v16, %v1802_v21  ;;  %v2042_v38 = vadd.f32 %v2031_v17, %v1924_v31  ;;  %v2361_v16 = vld [vmem:[%s5607_s8 + $0x80] sm:$0xff]  ;;  %v3517_v31 = vld [vmem:[%s5608_s9 + $0x90] sm:$0xff] }
 0x3bf   : > { %v3503_v17 = vld [vmem:[%s5607_s8 + $0x120] sm:$0xff] }
 0x3c0   : > { %v1919_v19 = vpop.f32.mrf.mxu0  ;;  %v2043_v35 = vadd.f32 %v2033_v20, %v1925_v27  ;;  %2523 = vmatpush2.msra.mxu0 %v3503_v17  ;;  %v3518_v27 = vld [vmem:[%s5608_s9 + $0x98] sm:$0xff]  ;;  %v3544_v17 = vld [vmem:[%s5608_s9 + $0x150] sm:$0xff] }
 0x3c1   : > { %v1926_v30 = vadd.f32 %v1919_v19, %v1806_v22  ;;  %3666 = vmatprep.subr.mxu0 %v3919_v50 }
 0x3c2   : > { %v1921_v25 = vpop.f32.mrf.mxu0 }
 0x3c3   : > { %v1927_v32 = vadd.f32 %v1921_v25, %v1808_v26  ;;  %v2044_v36 = vadd.f32 %v2037_v28, %v1926_v30  ;;  %v2544_v26 = vld [vmem:[%s5608_s9 + $0x48] sm:$0xff]  ;;  %v2543_v30 = vld [vmem:[%s5608_s9 + $0x40] sm:$0xff]  ;;  %v2542_v28 = vld [vmem:[%s5608_s9 + $0x38] sm:$0xff] }
 0x3c5   : > { %v2045_v43 = vadd.f32 %v2039_v37, %v1927_v32  ;;  %v2541_v32 = vld [vmem:[%s5608_s9 + $0x30] sm:$0xff] }
 0x3c6   : > { %v3513_v37 = vld [vmem:[%s5608_s9 + $0x70] sm:$0xff] }
 0x3d2   : > { %v2149_v29 = vpop.f32.mrf.mxu0 }
 0x3d3   : > { %v2160_v44 = vadd.f32 %v2149_v29, %v2042_v38  ;;  %v3516_v29 = vld [vmem:[%s5608_s9 + $0x88] sm:$0xff]  ;;  %v2538_v38 = vld [vmem:[%s5608_s9 + $0x18] sm:$0xff] }
 0x3d4   : > { %v2151_v33 = vpop.f32.mrf.mxu0 }
 0x3d5   : > { %v2161_v40 = vadd.f32 %v2151_v33, %v2043_v35  ;;  %v2176_v54 = vadd.f32 %v2169_v45, %v2160_v44  ;;  %v3515_v33 = vld [vmem:[%s5608_s9 + $0x80] sm:$0xff]  ;;  %v3514_v35 = vld [vmem:[%s5608_s9 + $0x78] sm:$0xff] }
 0x3d6   : > { %v2155_v39 = vpop.f32.mrf.mxu0  ;;  %v2535_v44 = vld [vmem:[%s5608_s9] sm:$0xff] }
 0x3d7   : > { %v2162_v42 = vadd.f32 %v2155_v39, %v2044_v36  ;;  %v2177_v52 = vadd.f32 %v2173_v41, %v2161_v40  ;;  %v2180_v57 = vmax.f32 %v2176_v54, 0.0  ;;  %v2539_v36 = vld [vmem:[%s5608_s9 + $0x20] sm:$0xff]  ;;  %v3512_v39 = vld [vmem:[%s5608_s9 + $0x68] sm:$0xff]  ;;  %v2537_v40 = vld [vmem:[%s5608_s9 + $0x10] sm:$0xff] }
 0x3d8   : > { %v2157_v46 = vpop.f32.mrf.mxu0  ;;  %v3529_v54 = vld [vmem:[%s5608_s9 + $0xe8] sm:$0xff] }
 0x3d9   : > { %v2163_v48 = vadd.f32 %v2157_v46, %v2045_v43  ;;  %v2178_v51 = vadd.f32 %v2169_v45, %v2162_v42  ;;  %v2181_v56 = vmax.f32 %v2177_v52, 0.0  ;;  %v2536_v42 = vld [vmem:[%s5608_s9 + $0x8] sm:$0xff]  ;;  %v3510_v43 = vld [vmem:[%s5608_s9 + $0x58] sm:$0xff]  ;;  %v3509_v45 = vld [vmem:[%s5608_s9 + $0x50] sm:$0xff] }
 0x3db   : > { %v2179_v53 = vadd.f32 %v2173_v41, %v2163_v48  ;;  %v2182_v49 = vmax.f32 %v2178_v51, 0.0  ;;  %v3511_v41 = vld [vmem:[%s5608_s9 + $0x60] sm:$0xff] }
 0x3dd   : > { %v2183_v55 = vmax.f32 %v2179_v53, 0.0 }
 0x3df   : > { %3479 = vmatprep.subr.msk.mxu1 %vm2189_vm6, %v2183_v55 }
 0x3e0   : > { %3480 = vmatpush1.msk.msra.mxu1 %vm2189_vm6, %v2182_v49 }
 0x3e1   : > { %2226 = vmatprep.subr.mxu1 %v2181_v56 }
 0x3e2   : > { %2227 = vmatpush1.msra.mxu1 %v2180_v57 }
 0x3e3   : > { %3481 = vmatmul.mubr.msk.f32.vlgmr.msra.gmra.mxu1 %vm2185_vm7, %v2184_v24  ;;  %3483 = vmatprep.subr.msk.mxu1 %vm2189_vm6, %v2183_v55  ;;  %v3540_v55 = vld [vmem:[%s5608_s9 + $0x138] sm:$0xff]  ;;  %v3539_v24 = vld [vmem:[%s5608_s9 + $0x130] sm:$0xff] }
 0x3e4   : > { %3484 = vmatpush1.msk.msra.mxu1 %vm2189_vm6, %v2182_v49  ;;  %2336 = vmatprep.mubr.f32.mxu1 %v3919_v50 }
 0x3e5   : > { %2302 = vmatprep.subr.mxu1 %v2181_v56 }
 0x3e6   : > { %2303 = vmatpush1.msra.mxu1 %v2180_v57  ;;  %v3528_v57 = vld [vmem:[%s5608_s9 + $0xe0] sm:$0xff] }
 0x3e7   : > { %3485 = vmatmul.mubr.msk.f32.vlgmr.msra.gmra.mxu1 %vm2185_vm7, %v3482_v3  ;;  %2369 = vmatprep.subr.mxu1 %v3919_v50  ;;  %v3527_v3 = vld [vmem:[%s5608_s9 + $0xd8] sm:$0xff] }
 0x3e8   : > { %2370 = vmatpush1.msra.mxu1 %v2360_v18  ;;  %v3538_v18 = vld [vmem:[%s5608_s9 + $0x128] sm:$0xff] }
 0x3e9   : > { %2371 = vmatprep.subr.mxu1 %v3919_v50 }
 0x3ea   : > { %2372 = vmatpush1.msra.mxu1 %v2359_v47  ;;  %v3526_v47 = vld [vmem:[%s5608_s9 + $0xd0] sm:$0xff] }
 0x3eb   : > { %2373 = vmatprep.subr.mxu1 %v3919_v50 }
 0x3ec   : > { %2374 = vmatpush1.msra.mxu1 %v2358_v59  ;;  %v3537_v59 = vld [vmem:[%s5608_s9 + $0x120] sm:$0xff] }
 0x3ed   : > { %2375 = vmatprep.subr.mxu1 %v3919_v50 }
 0x3ee   : > { %2376 = vmatpush1.msra.mxu1 %v2357_v60  ;;  %v3525_v60 = vld [vmem:[%s5608_s9 + $0xc8] sm:$0xff] }
 0x3ef   : > { %2377 = vmatprep.subr.mxu1 %v3919_v50 }
 0x3f0   : > { %2378 = vmatpush1.msra.mxu1 %v2356_v58  ;;  %v3536_v58 = vld [vmem:[%s5608_s9 + $0x118] sm:$0xff] }
 0x3f1   : > { %2379 = vmatprep.subr.mxu1 %v3919_v50 }
 0x3f2   : > { %2380 = vmatpush1.msra.mxu1 %v2355_v61  ;;  %v3524_v61 = vld [vmem:[%s5608_s9 + $0xc0] sm:$0xff] }
 0x3f3   : > { %2381 = vmatprep.subr.mxu1 %v3919_v50 }
 0x3f4   : > { %2382 = vmatpush1.msra.mxu1 %v2354_v62  ;;  %v3535_v62 = vld [vmem:[%s5608_s9 + $0x110] sm:$0xff] }
 0x3f5   : > { %2383 = vmatprep.subr.mxu1 %v3919_v50 }
 0x3f6   : > { %2384 = vmatpush1.msra.mxu1 %v2353_v63  ;;  %v3523_v63 = vld [vmem:[%s5608_s9 + $0xb8] sm:$0xff] }
 0x3f7   : > { %2385 = vmatprep.subr.mxu1 %v3919_v50 }
 0x3f8   : > { %2386 = vmatpush1.msra.mxu1 %v2352_v0  ;;  %v3534_v0 = vld [vmem:[%s5608_s9 + $0x108] sm:$0xff] }
 0x3f9   : > { %2387 = vmatprep.subr.mxu1 %v3919_v50 }
 0x3fa   : > { %2388 = vmatpush1.msra.mxu1 %v2351_v1  ;;  %v3522_v1 = vld [vmem:[%s5608_s9 + $0xb0] sm:$0xff] }
 0x3fb   : > { %2389 = vmatprep.subr.mxu1 %v3919_v50 }
 0x3fc   : > { %2390 = vmatpush1.msra.mxu1 %v2350_v2  ;;  %v3533_v2 = vld [vmem:[%s5608_s9 + $0x100] sm:$0xff] }
 0x3fd   : > { %2391 = vmatprep.subr.mxu1 %v3919_v50 }
 0x3fe   : > { %2392 = vmatpush1.msra.mxu1 %v2349_v4  ;;  %v3521_v4 = vld [vmem:[%s5608_s9 + $0xa8] sm:$0xff] }
 0x3ff   : > { %2393 = vmatprep.subr.mxu1 %v3919_v50 }
 0x400   : > { %2394 = vmatpush1.msra.mxu1 %v2348_v5  ;;  %v3532_v5 = vld [vmem:[%s5608_s9 + $0xf8] sm:$0xff] }
 0x401   : > { %2395 = vmatprep.subr.mxu1 %v3919_v50 }
 0x402   : > { %2396 = vmatpush1.msra.mxu1 %v2347_v6  ;;  %v3520_v6 = vld [vmem:[%s5608_s9 + $0xa0] sm:$0xff] }
 0x403   : > { %2397 = vmatprep.subr.mxu1 %v3919_v50 }
 0x404   : > { %2398 = vmatpush1.msra.mxu1 %v2346_v7  ;;  %v3531_v7 = vld [vmem:[%s5608_s9 + $0xf0] sm:$0xff] }
 0x405   : > { %2399 = vmatprep.subr.mxu1 %v3919_v50 }
 0x406   : > { %2400 = vmatpush1.msra.mxu1 %v2345_v8 }
 0x407   : > { %2425 = vmatprep.subr.mxu1 %v3919_v50 }
 0x408   : > { %2426 = vmatpush2.msra.mxu1 %v2364_v10  ;;  %v3551_v10 = vld [vmem:[%s5608_s9 + $0x188] sm:$0xff] }
 0x409   : > { %2427 = vmatprep.subr.mxu1 %v3919_v50 }
 0x40a   : > { %2428 = vmatpush2.msra.mxu1 %v2363_v12  ;;  %v3549_v12 = vld [vmem:[%s5608_s9 + $0x178] sm:$0xff] }
 0x40b   : > { %2429 = vmatprep.subr.mxu1 %v3919_v50 }
 0x40c   : > { %2430 = vmatpush2.msra.mxu1 %v2362_v14  ;;  %v3547_v14 = vld [vmem:[%s5608_s9 + $0x168] sm:$0xff] }
 0x40d   : > { %2431 = vmatprep.subr.mxu1 %v3919_v50 }
 0x40e   : > { %2432 = vmatpush2.msra.mxu1 %v2361_v16  ;;  %v3545_v16 = vld [vmem:[%s5608_s9 + $0x158] sm:$0xff] }
 0x40f   : > { %3643 = vmatprep.subr.mxu1 %v3919_v50 }
 0x4a3   : > { %v2262_v19 = vpop.f32.mrf.mxu1 }
 0x4a5   : > { %v2264_v20 = vpop.f32.mrf.mxu1 }
 0x4a7   : > { %v2338_v21 = vpop.f32.mrf.mxu1 }
 0x4a8   : > { %v2343_v25 = vmax.f32 %v2262_v19, %v2338_v21  ;;  %v3543_v19 = vld [vmem:[%s5608_s9 + $0x148] sm:$0xff] }
 0x4a9   : > { %v2340_v22 = vpop.f32.mrf.mxu1 }
 0x4aa   : > { %v2344_v23 = vmax.f32 %v2264_v20, %v2340_v22  ;;  %v3542_v20 = vld [vmem:[%s5608_s9 + $0x140] sm:$0xff]  ;;  %v2979_v22 = vld [vmem:[%s5610_s11 + $0x70] sm:$0xff] }
 0x4ac   : > { %3486 = vmatprep.mubr.msk.f32.mxu1 %vm2365_vm8, %v2344_v23  ;;  %3507 = vmatprep.mubr.msk.f32.mxu0 %vm2365_vm8, %v2344_v23  ;;  %v2978_v23 = vld [vmem:[%s5610_s11 + $0x68] sm:$0xff] }
 0x4ad   : > { %2434 = vmatmul.mubr.f32.vlgmr.msra.gmra.mxu1 %v2343_v25  ;;  %2525 = vmatmul.mubr.f32.vlgmr.msra.gmra.mxu0 %v2343_v25  ;;  %v2977_v25 = vld [vmem:[%s5610_s11 + $0x60] sm:$0xff] }
 0x4ae   : > { %3644 = vmatpush3.msra.mxu1 %v2544_v26  ;;  %3667 = vmatpush3.msra.mxu0 %v3518_v27  ;;  %v2976_v26 = vld [vmem:[%s5610_s11 + $0x58] sm:$0xff]  ;;  %v2975_v27 = vld [vmem:[%s5610_s11 + $0x50] sm:$0xff] }
 0x4af   : > { %3645 = vmatprep.subr.mxu1 %v3919_v50  ;;  %3668 = vmatprep.subr.mxu0 %v3919_v50 }
 0x4b0   : > { %3646 = vmatpush3.msra.mxu1 %v2543_v30  ;;  %3669 = vmatpush3.msra.mxu0 %v3517_v31  ;;  %v2974_v30 = vld [vmem:[%s5610_s11 + $0x48] sm:$0xff]  ;;  %v2973_v31 = vld [vmem:[%s5610_s11 + $0x40] sm:$0xff] }
 0x4b1   : > { %3647 = vmatprep.subr.mxu1 %v3919_v50  ;;  %3670 = vmatprep.subr.mxu0 %v3919_v50 }
 0x4b2   : > { %3648 = vmatpush3.msra.mxu1 %v2542_v28  ;;  %3671 = vmatpush3.msra.mxu0 %v3516_v29  ;;  %v2972_v28 = vld [vmem:[%s5610_s11 + $0x38] sm:$0xff]  ;;  %v2971_v29 = vld [vmem:[%s5610_s11 + $0x30] sm:$0xff] }
 0x4b3   : > { %3649 = vmatprep.subr.mxu1 %v3919_v50  ;;  %3672 = vmatprep.subr.mxu0 %v3919_v50 }
 0x4b4   : > { %3650 = vmatpush3.msra.mxu1 %v2541_v32  ;;  %3673 = vmatpush3.msra.mxu0 %v3515_v33  ;;  %v2970_v32 = vld [vmem:[%s5610_s11 + $0x28] sm:$0xff]  ;;  %v2969_v33 = vld [vmem:[%s5610_s11 + $0x20] sm:$0xff] }
 0x4b5   : > { %3651 = vmatprep.subr.mxu1 %v3919_v50  ;;  %3674 = vmatprep.subr.mxu0 %v3919_v50 }
 0x4b6   : > { %3652 = vmatpush3.msra.mxu1 %v2540_v34  ;;  %3675 = vmatpush3.msra.mxu0 %v3514_v35  ;;  %v2968_v34 = vld [vmem:[%s5610_s11 + $0x18] sm:$0xff]  ;;  %v2967_v35 = vld [vmem:[%s5610_s11 + $0x10] sm:$0xff] }
 0x4b7   : > { %3653 = vmatprep.subr.mxu1 %v3919_v50  ;;  %3676 = vmatprep.subr.mxu0 %v3919_v50 }
 0x4b8   : > { %3654 = vmatpush3.msra.mxu1 %v2539_v36  ;;  %3677 = vmatpush3.msra.mxu0 %v3513_v37  ;;  %v2966_v36 = vld [vmem:[%s5610_s11 + $0x8] sm:$0xff]  ;;  %v2965_v37 = vld [vmem:[%s5610_s11] sm:$0xff] }
 0x4b9   : > { %3655 = vmatprep.subr.mxu1 %v3919_v50  ;;  %3678 = vmatprep.subr.mxu0 %v3919_v50 }
 0x4ba   : > { %3656 = vmatpush3.msra.mxu1 %v2538_v38  ;;  %3679 = vmatpush3.msra.mxu0 %v3512_v39  ;;  %v3066_v38 = vld [vmem:[%s5612_s13 + $0x50] sm:$0xf]  ;;  %v3065_v39 = vld [vmem:[%s5612_s13 + $0x48] sm:$0xff] }
 0x4bb   : > { %3657 = vmatprep.subr.mxu1 %v3919_v50  ;;  %3680 = vmatprep.subr.mxu0 %v3919_v50 }
 0x4bc   : > { %3658 = vmatpush3.msra.mxu1 %v2537_v40  ;;  %3681 = vmatpush3.msra.mxu0 %v3511_v41  ;;  %v3064_v40 = vld [vmem:[%s5612_s13 + $0x40] sm:$0xff]  ;;  %v3063_v41 = vld [vmem:[%s5612_s13 + $0x38] sm:$0xff] }
 0x4bd   : > { %3659 = vmatprep.subr.mxu1 %v3919_v50  ;;  %3682 = vmatprep.subr.mxu0 %v3919_v50 }
 0x4be   : > { %3660 = vmatpush3.msra.mxu1 %v2536_v42  ;;  %3683 = vmatpush3.msra.mxu0 %v3510_v43  ;;  %v3062_v42 = vld [vmem:[%s5612_s13 + $0x30] sm:$0xff]  ;;  %v3061_v43 = vld [vmem:[%s5612_s13 + $0x28] sm:$0xff] }
 0x4bf   : > { %3661 = vmatprep.subr.mxu1 %v3919_v50  ;;  %3684 = vmatprep.subr.mxu0 %v3919_v50 }
 0x4c0   : > { %3662 = vmatpush3.msra.mxu1 %v2535_v44  ;;  %3685 = vmatpush3.msra.mxu0 %v3509_v45  ;;  %v3060_v44 = vld [vmem:[%s5612_s13 + $0x20] sm:$0xff]  ;;  %v3059_v45 = vld [vmem:[%s5612_s13 + $0x18] sm:$0xff] }
 0x4c1   : > { %3663 = vmatprep.mubr.msk.f32.mxu1 %vm3920_vm9, %v3919_v50  ;;  %3686 = vmatprep.mubr.msk.f32.mxu0 %vm3920_vm9, %v3919_v50 }
 0x4c2   : > { %3689 = vmatprep.subr.mxu1 %v3919_v50  ;;  %3712 = vmatprep.subr.mxu0 %v3919_v50 }
 0x56d   : > { %v2435_v46 = vpop.f32.mrf.mxu1  ;;  %v2526_v48 = vpop.f32.mrf.mxu0 }
 0x56e   : > { %v2530_v51 = vmax.f32 %v2435_v46, %v2526_v48 }
 0x56f   : > { %v2437_v52 = vpop.f32.mrf.mxu1  ;;  %v2528_v53 = vpop.f32.mrf.mxu0 }
 0x570   : > { %2532 = vst.msk [vmem:[#allocation3] sm:$0x1f] %vm2531_vm10, %v2530_v51 }
 0x577   : > { %v2534_v49 = vld [vmem:[#allocation3] sm:$0x1]  ;;  %v2620_v56 = vld [vmem:[#allocation3 + $0x1] sm:$0x1]  ;;  %v2706_v8 = vld [vmem:[#allocation3 + $0x2] sm:$0x1] }
 0x578   : > { %3664 = vmatmul.mubr.msk.f32.vlgmr.msra.gmra.mxu1 %vm2545_vm11, %v2534_v49  ;;  %3687 = vmatmul.mubr.msk.f32.vlgmr.msra.gmra.mxu0 %vm2545_vm11, %v2620_v56  ;;  %v2792_v9 = vld [vmem:[#allocation3 + $0x3] sm:$0x1]  ;;  %v2878_v21 = vld [vmem:[#allocation3 + $0x4] sm:$0x1]  ;;  %v2533_v56 = vld [vmem:[%s5609_s10] sm:$0x1] }
 0x579   : > { %3690 = vmatpush3.msra.mxu1 %v3529_v54  ;;  %3713 = vmatpush3.msra.mxu0 %v3540_v55 }
 0x57a   : > { %3691 = vmatprep.subr.mxu1 %v3919_v50  ;;  %3714 = vmatprep.subr.mxu0 %v3919_v50 }
 0x57b   : > { %3692 = vmatpush3.msra.mxu1 %v3528_v57  ;;  %3715 = vmatpush3.msra.mxu0 %v3539_v24 }
 0x57c   : > { %3693 = vmatprep.subr.mxu1 %v3919_v50  ;;  %3716 = vmatprep.subr.mxu0 %v3919_v50 }
 0x57d   : > { %3694 = vmatpush3.msra.mxu1 %v3527_v3  ;;  %3717 = vmatpush3.msra.mxu0 %v3538_v18 }
 0x57e   : > { %3695 = vmatprep.subr.mxu1 %v3919_v50  ;;  %3718 = vmatprep.subr.mxu0 %v3919_v50 }
 0x57f   : > { %3696 = vmatpush3.msra.mxu1 %v3526_v47  ;;  %3719 = vmatpush3.msra.mxu0 %v3537_v59 }
 0x580   : > { %3697 = vmatprep.subr.mxu1 %v3919_v50  ;;  %3720 = vmatprep.subr.mxu0 %v3919_v50 }
 0x581   : > { %3698 = vmatpush3.msra.mxu1 %v3525_v60  ;;  %3721 = vmatpush3.msra.mxu0 %v3536_v58 }
 0x582   : > { %3699 = vmatprep.subr.mxu1 %v3919_v50  ;;  %3722 = vmatprep.subr.mxu0 %v3919_v50 }
 0x583   : > { %3700 = vmatpush3.msra.mxu1 %v3524_v61  ;;  %3723 = vmatpush3.msra.mxu0 %v3535_v62  ;;  %v3058_v61 = vld [vmem:[%s5612_s13 + $0x10] sm:$0xff]  ;;  %v3057_v62 = vld [vmem:[%s5612_s13 + $0x8] sm:$0xff] }
 0x584   : > { %3701 = vmatprep.subr.mxu1 %v3919_v50  ;;  %3724 = vmatprep.subr.mxu0 %v3919_v50 }
 0x585   : > { %3702 = vmatpush3.msra.mxu1 %v3523_v63  ;;  %3725 = vmatpush3.msra.mxu0 %v3534_v0  ;;  %v3056_v63 = vld [vmem:[%s5612_s13] sm:$0xff] }
 0x586   : > { %3703 = vmatprep.subr.mxu1 %v3919_v50  ;;  %3726 = vmatprep.subr.mxu0 %v3919_v50  ;;  %v2980_v0 = vld [vmem:[%s5611_s12] sm:$0x1] }
 0x587   : > { %3704 = vmatpush3.msra.mxu1 %v3522_v1  ;;  %3727 = vmatpush3.msra.mxu0 %v3533_v2 }
 0x588   : > { %3705 = vmatprep.subr.mxu1 %v3919_v50  ;;  %3728 = vmatprep.subr.mxu0 %v3919_v50 }
 0x589   : > { %3706 = vmatpush3.msra.mxu1 %v3521_v4  ;;  %3729 = vmatpush3.msra.mxu0 %v3532_v5 }
 0x58a   : > { %3707 = vmatprep.subr.mxu1 %v3919_v50  ;;  %3730 = vmatprep.subr.mxu0 %v3919_v50 }
 0x58b   : > { %3708 = vmatpush3.msra.mxu1 %v3520_v6  ;;  %3709 = vmatprep.mubr.msk.f32.mxu1 %vm3920_vm9, %v3919_v50 }
 0x58c   : > { %3731 = vmatpush3.msra.mxu0 %v3531_v7  ;;  %3732 = vmatprep.mubr.msk.f32.mxu0 %vm3920_vm9, %v3919_v50 }
 0x58d   : > { %3710 = vmatmul.mubr.msk.f32.vlgmr.msra.gmra.mxu1 %vm2545_vm11, %v2706_v8  ;;  %3733 = vmatmul.mubr.msk.f32.vlgmr.msra.gmra.mxu0 %vm2545_vm11, %v2792_v9 }
 0x58e   : > { %3735 = vmatprep.subr.mxu1 %v3919_v50  ;;  %3755 = vmatprep.mubr.msk.f32.mxu1 %vm3920_vm9, %v3919_v50 }
 0x58f   : > { %3736 = vmatpush3.msra.mxu1 %v3551_v10  ;;  %3758 = vmatprep.subr.mxu0 %v3919_v50 }
 0x590   : > { %3737 = vmatprep.subr.mxu1 %v3919_v50  ;;  %3788 = vmatprep.mubr.msk.f32.mxu0 %vm3920_vm9, %v3919_v50 }
 0x591   : > { %3738 = vmatpush3.msra.mxu1 %v3550_v11  ;;  %3759 = vmatpush3.msra.mxu0 %v2979_v22 }
 0x592   : > { %3739 = vmatprep.subr.mxu1 %v3919_v50  ;;  %3760 = vmatprep.subr.mxu0 %v3919_v50 }
 0x593   : > { %3740 = vmatpush3.msra.mxu1 %v3549_v12  ;;  %3761 = vmatpush3.msra.mxu0 %v2978_v23 }
 0x594   : > { %3741 = vmatprep.subr.mxu1 %v3919_v50  ;;  %3762 = vmatprep.subr.mxu0 %v3919_v50 }
 0x595   : > { %3742 = vmatpush3.msra.mxu1 %v3548_v13  ;;  %3763 = vmatpush3.msra.mxu0 %v2977_v25 }
 0x596   : > { %3743 = vmatprep.subr.mxu1 %v3919_v50  ;;  %3764 = vmatprep.subr.mxu0 %v3919_v50 }
 0x597   : > { %3744 = vmatpush3.msra.mxu1 %v3547_v14  ;;  %3765 = vmatpush3.msra.mxu0 %v2976_v26 }
 0x598   : > { %3745 = vmatprep.subr.mxu1 %v3919_v50  ;;  %3766 = vmatprep.subr.mxu0 %v3919_v50 }
 0x599   : > { %3746 = vmatpush3.msra.mxu1 %v3546_v15  ;;  %3767 = vmatpush3.msra.mxu0 %v2975_v27 }
 0x59a   : > { %3747 = vmatprep.subr.mxu1 %v3919_v50  ;;  %3768 = vmatprep.subr.mxu0 %v3919_v50 }
 0x59b   : > { %3748 = vmatpush3.msra.mxu1 %v3545_v16  ;;  %3769 = vmatpush3.msra.mxu0 %v2974_v30 }
 0x59c   : > { %3749 = vmatprep.subr.mxu1 %v3919_v50  ;;  %3770 = vmatprep.subr.mxu0 %v3919_v50 }
 0x59d   : > { %3750 = vmatpush3.msra.mxu1 %v3544_v17  ;;  %3771 = vmatpush3.msra.mxu0 %v2973_v31 }
 0x59e   : > { %3751 = vmatprep.subr.mxu1 %v3919_v50  ;;  %3772 = vmatprep.subr.mxu0 %v3919_v50 }
 0x59f   : > { %3752 = vmatpush3.msra.mxu1 %v3543_v19  ;;  %3773 = vmatpush3.msra.mxu0 %v2972_v28 }
 0x5a0   : > { %3753 = vmatprep.subr.mxu1 %v3919_v50  ;;  %3774 = vmatprep.subr.mxu0 %v3919_v50 }
 0x5a1   : > { %3754 = vmatpush3.msra.mxu1 %v3542_v20  ;;  %3775 = vmatpush3.msra.mxu0 %v2971_v29 }
 0x5a2   : > { %3756 = vmatmul.mubr.msk.f32.vlgmr.msra.gmra.mxu1 %vm2545_vm11, %v2878_v21  ;;  %3791 = vmatprep.subr.mxu1 %v3919_v50 }
 0x5a3   : > { %3813 = vmatprep.mubr.msk.f32.mxu1 %vm3920_vm9, %v3919_v50  ;;  %3776 = vmatprep.subr.mxu0 %v3919_v50 }
 0x5a4   : > { %3777 = vmatpush3.msra.mxu0 %v2970_v32  ;;  %3792 = vmatpush3.msk.msra.mxu1 %vm1203_vm1, %v3066_v38 }
 0x5a5   : > { %3778 = vmatprep.subr.mxu0 %v3919_v50  ;;  %3793 = vmatprep.subr.mxu1 %v3919_v50 }
 0x5a6   : > { %3779 = vmatpush3.msra.mxu0 %v2969_v33  ;;  %3794 = vmatpush3.msra.mxu1 %v3065_v39 }
 0x5a7   : > { %3780 = vmatprep.subr.mxu0 %v3919_v50  ;;  %3795 = vmatprep.subr.mxu1 %v3919_v50 }
 0x5a8   : > { %3781 = vmatpush3.msra.mxu0 %v2968_v34  ;;  %3796 = vmatpush3.msra.mxu1 %v3064_v40 }
 0x5a9   : > { %3782 = vmatprep.subr.mxu0 %v3919_v50  ;;  %3797 = vmatprep.subr.mxu1 %v3919_v50 }
 0x5aa   : > { %3783 = vmatpush3.msra.mxu0 %v2967_v35  ;;  %3798 = vmatpush3.msra.mxu1 %v3063_v41 }
 0x5ab   : > { %3784 = vmatprep.subr.mxu0 %v3919_v50  ;;  %3799 = vmatprep.subr.mxu1 %v3919_v50 }
 0x5ac   : > { %3785 = vmatpush3.msra.mxu0 %v2966_v36  ;;  %3800 = vmatpush3.msra.mxu1 %v3062_v42 }
 0x5ad   : > { %3786 = vmatprep.subr.mxu0 %v3919_v50  ;;  %3801 = vmatprep.subr.mxu1 %v3919_v50 }
 0x5ae   : > { %3787 = vmatpush3.msra.mxu0 %v2965_v37  ;;  %3802 = vmatpush3.msra.mxu1 %v3061_v43 }
 0x5af   : > { %3803 = vmatprep.subr.mxu1 %v3919_v50 }
 0x5b0   : > { %3804 = vmatpush3.msra.mxu1 %v3060_v44 }
 0x5b1   : > { %3805 = vmatprep.subr.mxu1 %v3919_v50 }
 0x5b2   : > { %3806 = vmatpush3.msra.mxu1 %v3059_v45 }
 0x5b3   : > { %3807 = vmatprep.subr.mxu1 %v3919_v50 }
 0x5b4   : > { %3808 = vmatpush3.msra.mxu1 %v3058_v61 }
 0x5b5   : > { %3809 = vmatprep.subr.mxu1 %v3919_v50 }
 0x5b6   : > { %3810 = vmatpush3.msra.mxu1 %v3057_v62 }
 0x5b7   : > { %3811 = vmatprep.subr.mxu1 %v3919_v50  ;;  %v3067_v50 = vld [vmem:[%s5613_s14] sm:$0x1] }
 0x5b8   : > { %3812 = vmatpush3.msra.mxu1 %v3056_v63 }
 0x638   : > { %v2615_v46 = vpop.f32.mrf.mxu1  ;;  %v2701_v48 = vpop.f32.mrf.mxu0 }
 0x639   : > { %v2619_v57 = vadd.f32 %v2615_v46, %v2533_v56 }
 0x63a   : > { %v3665_v51 = vpop.f32.mrf.mxu1  ;;  %v3688_v52 = vpop.f32.mrf.mxu0 }
 0x63b   : > { %v2705_v24 = vadd.f32 %v2701_v48, %v2619_v57 }
 0x64d   : > { %v2787_v53 = vpop.f32.mrf.mxu1  ;;  %v2873_v54 = vpop.f32.mrf.mxu0 }
 0x64e   : > { %v2791_v3 = vadd.f32 %v2787_v53, %v2705_v24 }
 0x64f   : > { %v3711_v55 = vpop.f32.mrf.mxu1  ;;  %v3734_v49 = vpop.f32.mrf.mxu0 }
 0x650   : > { %v2877_v18 = vadd.f32 %v2873_v54, %v2791_v3 }
 0x662   : > { %v2959_v47 = vpop.f32.mrf.mxu1 }
 0x663   : > { %v2963_v59 = vadd.f32 %v2959_v47, %v2877_v18 }
 0x664   : > { %v3757_v60 = vpop.f32.mrf.mxu1 }
 0x665   : > { %v2964_v58 = vmax.f32 %v2963_v59, 0.0 }
 0x667   : > { %3789 = vmatmul.mubr.msk.f32.vlgmr.msra.gmra.mxu0 %vm2981_vm12, %v2964_v58 }
 0x727   : > { %v3051_v1 = vpop.f32.mrf.mxu0 }
 0x728   : > { %v3052_v2 = vadd.f32 %v3051_v1, %v2980_v0 }
 0x729   : > { %v3790_v4 = vpop.f32.mrf.mxu0 }
 0x72a   : > { %v3055_v5 = vmax.f32 %v3052_v2, 0.0 }
 0x72c   : > { %3814 = vmatmul.mubr.msk.f32.vlgmr.msra.gmra.mxu1 %vm1579_vm4, %v3055_v5 }
 0x7ec   : > { %v3140_v6 = vpop.f32.mrf.mxu1 }
 0x7ed   : > { %v3141_v7 = vadd.f32 %v3140_v6, %v3067_v50 }
 0x7ee   : > { %v3815_v8 = vpop.f32.mrf.mxu1 }
 0x7ef   : > { %3145 = vst.msk [vmem:[%s486_s27] sm:$0x1] %vm3144_vm13, %v3141_v7 }
 0x7f0   : > { %3870 = shalt.err (!%p3867_p3)
}
 0x7f1   : > { %s3871_s21 = scalar_lea.hbm %s5564_s25, 16  ;;  %s3875_s27 = scalar_lea.hbm %s5614_s15, 32 }
 0x7f2   : > { %p3872_p4 = scmp.ne.s32.totalorder %s5564_s25, %s3871_s21  ;;  %p3876_p9 = scmp.lt.s32.totalorder %s5564_s25, %s5614_s15 }
 0x7f3   : > { %p3877_p10 = scmp.lt.s32.totalorder %s3875_s27, %s3871_s21 }
 0x7f4   : > { %p3873_p7 = pnand %p3872_p4, %p4040_p5 }
 0x7f5   : > { %p3878_p11 = por %p3877_p10, %p3876_p9 }
 0x7f6   : > { %p3874_p8 = pneg %p3873_p7 }
 0x7f8   : > { %p3879_p12 = pnand %p3878_p11, %p3874_p8 }
 0x7fa   : > { %3882 = shalt.err (!%p3879_p12)
}
 0x7fb   : > { %3816 = dma.vmem_to_hbm [thread:$0]  (%p4040_p5), %s3160_s24, 16, %s5564_s25, %s3147_s30  }
 0x7fc PF: > { %s5629_s17 = sld [smem:[#allocation9_spill]] }
 0x7fd   : > { %s5630_s22 = sld [smem:[#allocation7_spill]] }
 0x802   : > { %p3822_p13 = scmp.ge.s32.totalorder %s5629_s17, 2 }
 0x803   : > { %s3171_s26 = sand.u32 1, %s5630_s22  }
 0x804   : > { %p3819_p0 = pnand %p3822_p13, %p4044_p6  ;;  %s3172_s23 = scalar_lea.sflag [#allocation5], %s3171_s26 }
 0x806   : > { %p3820_p1 = pneg %p3819_p0 }
 0x808   : > { %3900 = dma.done.wait (%p3820_p1), %s3172_s23, 16  }
 0x809   : > { %3902 = vsyncadd (%p3820_p1), %s3172_s23, 4294967280  ;;  %s5632_s21 = sld [smem:[#allocation10_spill]]  ;;  %s5635_s18 = smov %s3909_s19 }
 0x80a   : > { %s5633_s20 = sld [smem:[#allocation8_spill]] }
 0x80b   : > { %s5634_s27 = sld [smem:[#allocation11_spill]] }
 0x80f   : > { %p25_p2 = scmp.ge.s32.totalorder %s5632_s21, 4  }
 0x810   : > { %s5636_s19 = smov %s5633_s20 }
 0x811   : > { %s5637_s20 = smov %s5634_s27  ;;  %27 = sbr.rel (!%p25_p2) target bundleno = 3 (0x3), region = 131 }
 0x816   :  { %3176 = vsyncpa [#allocation5], 1 }
 0x817   :  { %3178 = vsyncpa [#allocation5 + $0x1], 1 }

</bundles_post_ra>
